<compile_context>
chip_gen: v6e
topology: v6e:2x2x1
jax: 0.10.0
libtpu: 0.0.40
codegen_flags: <defaults>
</compile_context>

<pallas_src>
import math
import functools

import numpy as np
import jax
import jax.numpy as jnp
from jax import lax
from jax.experimental import pallas as pl
from jax.experimental.pallas import tpu as pltpu


# ----------------------------------------------------------------------------
# Parameter / table construction (plain JAX / numpy glue)
# ----------------------------------------------------------------------------
def sinusoid_cos_sin(max_len, d_hid):
    """cos_position, sin_position of shape [max_len, d_hid], matching the
    RoPEPositionEncoding buffers (repeat_interleave(2) of cos/sin columns)."""
    position = np.arange(max_len, dtype=np.float32)[:, None]
    div_term = np.exp(
        np.arange(0, d_hid, 2, dtype=np.float32) * (-math.log(10000.0) / d_hid))
    table = np.zeros((max_len, d_hid), np.float32)
    table[:, 0::2] = np.sin(position * div_term)
    table[:, 1::2] = np.cos(position * div_term)
    cos_position = np.repeat(table[:, 1::2], 2, axis=-1)
    sin_position = np.repeat(table[:, ::2], 2, axis=-1)
    return jnp.asarray(cos_position), jnp.asarray(sin_position)


def make_rot_matrix(head_size):
    """R s.t. (x @ R)[:, 2k] = -x[:, 2k+1], (x @ R)[:, 2k+1] = x[:, 2k].
    R is a signed permutation, so folding it into weights is numerically exact."""
    rot = np.zeros((head_size, head_size), np.float32)
    for i in range(0, head_size, 2):
        rot[i + 1, i] = -1.0
        rot[i, i + 1] = 1.0
    return jnp.asarray(rot)


def _round_up(x, m):
    return ((x + m - 1) // m) * m


def _choose_tiles(s_pad, heads, hidden, head_size, out_itemsize,
                  budget_bytes=24 << 20):
    """VMEM-aware (tile_m, tile_n) selection + an explicit vmem limit."""
    tile_m = min(128, s_pad)          # s_pad is a multiple of 128 -> tile_m = 128

    def vmem_cost(tn):
        out_db = 2 * heads * tile_m * tn * out_itemsize        # out double buffer
        in_db = 2 * 4 * (tile_m * hidden                        # x tile
                         + hidden * 2 * head_size + 2 * head_size  # W_q2, b_q2
                         + 2 * tile_m * head_size               # cos, sin tiles
                         + tn * head_size                        # kw tile
                         + heads * tile_m + heads * tn)          # bias tiles
        return out_db + in_db

    candidates = [d for d in range(s_pad, 0, -128) if s_pad % d == 0]
    tile_n = candidates[-1]                                      # fallback: 128
    for d in candidates:
        if vmem_cost(d) <= budget_bytes:
            tile_n = d
            break
    vmem_limit = int(min(max(2 * vmem_cost(tile_n) + (4 << 20), 32 << 20),
                         56 << 20))    # stays under v7x's 64 MiB physical VMEM
    return tile_m, tile_n, vmem_limit


# ----------------------------------------------------------------------------
# Pallas kernel: one (batch, row-tile, col-tile) of the logits per grid step.
# ----------------------------------------------------------------------------
def _egp_kernel(x_ref, wq2_ref, bq2_ref, cos_ref, sin_ref,
                kw_ref, bq_ref, bk_ref, out_ref,
                *, head_size, tile_m, tile_n):
    hd = head_size

    # q-side projection (RoPE rotation folded into the weights) -> [TM, 2*hd]
    q2 = jnp.dot(x_ref[0], wq2_ref[...],
                 preferred_element_type=jnp.float32) + bq2_ref[...]
    # interleaved RoPE as pure VPU math
    qw_r = q2[:, :hd] * cos_ref[...] + q2[:, hd:] * sin_ref[...]   # [TM, hd]

    # base[m, n] = <qw_r[m], kw_r[n]> / sqrt(hd)   (A @ B^T on the MXU)
    base = lax.dot_general(qw_r, kw_ref[0], (((1,), (1,)), ((), ())),
                           preferred_element_type=jnp.float32)
    base = base * jnp.float32(1.0 / math.sqrt(hd))

    # tril penalty with global row/col indices (applied once, pre head-broadcast)
    m0 = pl.program_id(1) * tile_m
    n0 = pl.program_id(2) * tile_n
    rows = lax.broadcasted_iota(jnp.int32, (tile_m, tile_n), 0) + m0
    cols = lax.broadcasted_iota(jnp.int32, (tile_m, tile_n), 1) + n0
    base = base - (rows > cols).astype(jnp.float32) * jnp.float32(1e12)

    # logits[h, m, n] = base[m, n] + bias_q[h, m] + bias_k[h, n]
    # (padding masks were folded into the biases as -inf in the wrapper)
    out = base[None, :, :] + bq_ref[0][:, :, None] + bk_ref[0][:, None, :]
    out_ref[0] = out.astype(out_ref.dtype)


def efficient_global_pointer(x, mask, Wp, bp, Wq, bq, cos_pos, sin_pos,
                             *, heads, head_size, out_dtype=jnp.float32):
    """x: [B, S, H] f32; mask: [B, S] (1 keep / 0 pad). Returns [B, heads, S, S]."""
    B, S, H = x.shape
    hd = head_size
    if mask is None:
        mask = jnp.ones((B, S), jnp.float32)

    # --- pad sequence to a multiple of 128 (lane-dense output stores) ------
    S_pad = _round_up(S, 128)
    if S_pad != S:
        x = jnp.pad(x, ((0, 0), (0, S_pad - S), (0, 0)))
        mask = jnp.pad(mask, ((0, 0), (0, S_pad - S)))

    if cos_pos.shape[0] < S_pad:   # padded rows/cols are discarded anyway
        extra = S_pad - cos_pos.shape[0]
        cos_pos = jnp.pad(cos_pos, ((0, extra), (0, 0)))
        sin_pos = jnp.pad(sin_pos, ((0, extra), (0, 0)))
    cosS = cos_pos[:S_pad]
    sinS = sin_pos[:S_pad]

    # --- wrapper-side precompute: O(B*S*H), tiny vs the O(B*heads*S^2) kernel
    seq_out = x @ Wp + bp                                     # [B, S_pad, 2*hd]
    kw = seq_out[..., hd:]
    kw2 = jnp.stack([-kw[..., 1::2], kw[..., ::2]], axis=-1).reshape(kw.shape)
    kw_r = kw * cosS + kw2 * sinS                             # [B, S_pad, hd]

    bias_in = seq_out @ Wq + bq                               # [B, S_pad, 2*heads]
    keep = mask[:, None, :] > 0                               # [B, 1, S_pad]
    neg_inf = jnp.float32(-jnp.inf)
    bias_qT = jnp.where(keep, jnp.swapaxes(bias_in[..., 0::2], 1, 2), neg_inf)
    bias_kT = jnp.where(keep, jnp.swapaxes(bias_in[..., 1::2], 1, 2), neg_inf)
    # bias_qT / bias_kT: [B, heads, S_pad], row/col padding masks folded in.

    # q-side: RoPE rotation folded into the projection weights (exact).
    rot = make_rot_matrix(hd)
    Wp_q, bp_q = Wp[:, :hd], bp[:hd]
    W_q2 = jnp.concatenate([Wp_q, Wp_q @ rot], axis=1)        # [H, 2*hd]
    b_q2 = jnp.concatenate([bp_q, bp_q @ rot]).reshape(1, 2 * hd)

    # --- VMEM-aware tiling -------------------------------------------------
    out_itemsize = jnp.dtype(out_dtype).itemsize
    tile_m, tile_n, vmem_limit = _choose_tiles(S_pad, heads, H, hd, out_itemsize)
    num_m = S_pad // tile_m
    num_n = S_pad // tile_n

    kernel = functools.partial(_egp_kernel, head_size=hd,
                               tile_m=tile_m, tile_n=tile_n)

    out = pl.pallas_call(
        kernel,
        out_shape=jax.ShapeDtypeStruct((B, heads, S_pad, S_pad), out_dtype),
        grid=(B, num_m, num_n),
        in_specs=[
            pl.BlockSpec((1, tile_m, H), lambda b, mi, nj: (b, mi, 0)),       # x tile
            pl.BlockSpec((H, 2 * hd), lambda b, mi, nj: (0, 0)),              # W_q2
            pl.BlockSpec((1, 2 * hd), lambda b, mi, nj: (0, 0)),              # b_q2
            pl.BlockSpec((tile_m, hd), lambda b, mi, nj: (mi, 0)),            # cos tile
            pl.BlockSpec((tile_m, hd), lambda b, mi, nj: (mi, 0)),            # sin tile
            pl.BlockSpec((1, tile_n, hd), lambda b, mi, nj: (b, nj, 0)),      # kw_r tile
            pl.BlockSpec((1, heads, tile_m), lambda b, mi, nj: (b, 0, mi)),   # bias_q
            pl.BlockSpec((1, heads, tile_n), lambda b, mi, nj: (b, 0, nj)),   # bias_k
        ],
        out_specs=pl.BlockSpec((1, heads, tile_m, tile_n),
                               lambda b, mi, nj: (b, 0, mi, nj)),
        compiler_params=pltpu.CompilerParams(
            dimension_semantics=("parallel", "parallel", "parallel"),
            vmem_limit_bytes=vmem_limit),
    )(x, W_q2, b_q2, cosS, sinS, kw_r, bias_qT, bias_kT)

    return out[:, :, :S, :S]


# ----------------------------------------------------------------------------
# Pure-JAX reference (mirrors the PyTorch forward) for correctness checking.
# ----------------------------------------------------------------------------
def ref_forward(x, mask, Wp, bp, Wq, bq, cos_pos, sin_pos, *, heads, head_size):
    B, S, _ = x.shape
    seq_out = x @ Wp + bp
    qw, kw = seq_out[..., :head_size], seq_out[..., head_size:]
    cosS, sinS = cos_pos[:S], sin_pos[:S]

    def rope(t):
        t2 = jnp.stack([-t[..., 1::2], t[..., ::2]], axis=-1).reshape(t.shape)
        return t * cosS + t2 * sinS

    qw, kw = rope(qw), rope(kw)
    logits = jnp.einsum('bmd,bnd->bmn', qw, kw) / head_size ** 0.5
    bias_input = seq_out @ Wq + bq                               # [B, S, 2*heads]
    bias = bias_input.reshape(B, S, heads, 2).transpose(0, 2, 1, 3)
    logits = logits[:, None] + bias[..., :1] + jnp.swapaxes(bias[..., 1:], 2, 3)
    m1 = mask[:, None, :, None] > 0
    m2 = mask[:, None, None, :] > 0
    logits = jnp.where(m1, logits, -jnp.inf)
    logits = jnp.where(m2, logits, -jnp.inf)
    tril = jnp.tril(jnp.ones((S, S), jnp.float32), -1) * 1e12
    return logits - tril[None, None]


if __name__ == "__main__":
    B, S, HIDDEN = 2, 8, 32
    HEADS, HEAD_SIZE, MAX_LEN = 4, 16, 512

    key = jax.random.PRNGKey(0)
    kx, kwp, kbp, kwq, kbq = jax.random.split(key, 5)

    # deterministic synthetic parameters (PyTorch-Linear-style uniform init)
    lim_p = 1.0 / math.sqrt(HIDDEN)
    Wp = jax.random.uniform(kwp, (HIDDEN, 2 * HEAD_SIZE), jnp.float32, -lim_p, lim_p)
    bp = jax.random.uniform(kbp, (2 * HEAD_SIZE,), jnp.float32, -lim_p, lim_p)
    lim_q = 1.0 / math.sqrt(2 * HEAD_SIZE)
    Wq = jax.random.uniform(kwq, (2 * HEAD_SIZE, 2 * HEADS), jnp.float32, -lim_q, lim_q)
    bq = jax.random.uniform(kbq, (2 * HEADS,), jnp.float32, -lim_q, lim_q)

    cos_pos, sin_pos = sinusoid_cos_sin(MAX_LEN, HEAD_SIZE)

    x = jax.random.normal(kx, (B, S, HIDDEN), jnp.float32)
    mask = jnp.ones((B, S), jnp.float32).at[1, -2:].set(0.0)   # pad 2 tokens in batch 1

    out = efficient_global_pointer(x, mask, Wp, bp, Wq, bq, cos_pos, sin_pos,
                                   heads=HEADS, head_size=HEAD_SIZE)
    out = jax.block_until_ready(out)

    ref = ref_forward(x, mask, Wp, bp, Wq, bq, cos_pos, sin_pos,
                      heads=HEADS, head_size=HEAD_SIZE)
    ref = jax.block_until_ready(ref)

    assert out.shape == (B, HEADS, S, S), out.shape
    if not np.allclose(np.asarray(out), np.asarray(ref), rtol=1e-4, atol=1e-4):
        raise AssertionError("Pallas kernel output does not match reference")

    print("KERNEL_OK")
</pallas_src>

<mosaic_0001>
module attributes {stable_mosaic.version = 11 : i64} {
  func.func @_egp_kernel(%arg0: i32, %arg1: i32, %arg2: i32, %arg3: memref<1x128x32xf32, #tpu.memory_space<vmem>>, %arg4: memref<32x32xf32, #tpu.memory_space<vmem>>, %arg5: memref<1x32xf32, #tpu.memory_space<vmem>>, %arg6: memref<128x16xf32, #tpu.memory_space<vmem>>, %arg7: memref<128x16xf32, #tpu.memory_space<vmem>>, %arg8: memref<1x128x16xf32, #tpu.memory_space<vmem>>, %arg9: memref<1x4x128xf32, #tpu.memory_space<vmem>>, %arg10: memref<1x4x128xf32, #tpu.memory_space<vmem>>, %arg11: memref<1x4x128x128xf32, #tpu.memory_space<vmem>>) attributes {dimension_semantics = [#tpu.dimension_semantics<parallel>, #tpu.dimension_semantics<parallel>, #tpu.dimension_semantics<parallel>], iteration_bounds = array<i64: 2, 1, 1>, scalar_prefetch = 0 : i64, scratch_operands = 0 : i64, tpu.core_type = #tpu.core_type<tc>, window_params = [{transform_indices = @transform_0, window_bounds = array<i64: 1, 128, 32>}, {pipeline_mode = #tpu.pipeline_mode<synchronous>, transform_indices = @transform_1, window_bounds = array<i64: 32, 32>}, {pipeline_mode = #tpu.pipeline_mode<synchronous>, transform_indices = @transform_2, window_bounds = array<i64: 1, 32>}, {transform_indices = @transform_3, window_bounds = array<i64: 128, 16>}, {transform_indices = @transform_4, window_bounds = array<i64: 128, 16>}, {transform_indices = @transform_5, window_bounds = array<i64: 1, 128, 16>}, {transform_indices = @transform_6, window_bounds = array<i64: 1, 4, 128>}, {transform_indices = @transform_7, window_bounds = array<i64: 1, 4, 128>}, {transform_indices = @transform_8, window_bounds = array<i64: 1, 4, 128, 128>}]} {
    %c0 = arith.constant 0 : index
    %c0_0 = arith.constant 0 : index
    %c0_1 = arith.constant 0 : index
    %0 = vector.load %arg3[%c0, %c0_0, %c0_1] : memref<1x128x32xf32, #tpu.memory_space<vmem>>, vector<1x128x32xf32>
    %1 = vector.shape_cast %0 : vector<1x128x32xf32> to vector<128x32xf32>
    %c0_2 = arith.constant 0 : index
    %c0_3 = arith.constant 0 : index
    %2 = vector.load %arg4[%c0_2, %c0_3] : memref<32x32xf32, #tpu.memory_space<vmem>>, vector<32x32xf32>
    %cst = arith.constant dense<0.000000e+00> : vector<128x32xf32>
    %3 = tpu.matmul %1, %2, %cst {dimension_numbers = #tpu.dot_dimension_numbers<[1], [0], [0], [1], [0, 0, 1, 1], [], []>} : vector<128x32xf32>, vector<32x32xf32>, vector<128x32xf32> -> vector<128x32xf32>
    %c0_4 = arith.constant 0 : index
    %c0_5 = arith.constant 0 : index
    %4 = vector.load %arg5[%c0_4, %c0_5] : memref<1x32xf32, #tpu.memory_space<vmem>>, vector<1x32xf32>
    %5 = vector.broadcast %4 : vector<1x32xf32> to vector<128x32xf32>
    %6 = arith.addf %3, %5 : vector<128x32xf32>
    %7 = vector.extract_strided_slice %6 {offsets = [0, 0], sizes = [128, 16], strides = [1, 1]} : vector<128x32xf32> to vector<128x16xf32>
    %c0_6 = arith.constant 0 : index
    %c0_7 = arith.constant 0 : index
    %8 = vector.load %arg6[%c0_6, %c0_7] : memref<128x16xf32, #tpu.memory_space<vmem>>, vector<128x16xf32>
    %9 = arith.mulf %7, %8 : vector<128x16xf32>
    %10 = vector.extract_strided_slice %6 {offsets = [0, 16], sizes = [128, 16], strides = [1, 1]} : vector<128x32xf32> to vector<128x16xf32>
    %c0_8 = arith.constant 0 : index
    %c0_9 = arith.constant 0 : index
    %11 = vector.load %arg7[%c0_8, %c0_9] : memref<128x16xf32, #tpu.memory_space<vmem>>, vector<128x16xf32>
    %12 = arith.mulf %10, %11 : vector<128x16xf32>
    %13 = arith.addf %9, %12 : vector<128x16xf32>
    %c0_10 = arith.constant 0 : index
    %c0_11 = arith.constant 0 : index
    %c0_12 = arith.constant 0 : index
    %14 = vector.load %arg8[%c0_10, %c0_11, %c0_12] : memref<1x128x16xf32, #tpu.memory_space<vmem>>, vector<1x128x16xf32>
    %15 = vector.shape_cast %14 : vector<1x128x16xf32> to vector<128x16xf32>
    %cst_13 = arith.constant dense<0.000000e+00> : vector<128x128xf32>
    %16 = tpu.matmul %13, %15, %cst_13 {dimension_numbers = #tpu.dot_dimension_numbers<[1], [1], [0], [0], [0, 0, 1, 0], [], []>} : vector<128x16xf32>, vector<128x16xf32>, vector<128x128xf32> -> vector<128x128xf32>
    %cst_14 = arith.constant 2.500000e-01 : f32
    %17 = vector.broadcast %cst_14 : f32 to vector<128x128xf32>
    %18 = arith.mulf %16, %17 : vector<128x128xf32>
    %c128_i32 = arith.constant 128 : i32
    %19 = arith.muli %arg1, %c128_i32 : i32
    %c128_i32_15 = arith.constant 128 : i32
    %20 = arith.muli %arg2, %c128_i32_15 : i32
    %21 = tpu.iota {dimensions = array<i32: 0>} : vector<128x128xi32>
    %22 = vector.broadcast %19 : i32 to vector<128x128xi32>
    %23 = arith.addi %21, %22 : vector<128x128xi32>
    %24 = tpu.iota {dimensions = array<i32: 1>} : vector<128x128xi32>
    %25 = vector.broadcast %20 : i32 to vector<128x128xi32>
    %26 = arith.addi %24, %25 : vector<128x128xi32>
    %27 = arith.cmpi sgt, %23, %26 : vector<128x128xi32>
    %28 = arith.extui %27 : vector<128x128xi1> to vector<128x128xi32>
    %29 = arith.sitofp %28 : vector<128x128xi32> to vector<128x128xf32>
    %cst_16 = arith.constant 9.99999995E+11 : f32
    %30 = vector.broadcast %cst_16 : f32 to vector<128x128xf32>
    %31 = arith.mulf %29, %30 : vector<128x128xf32>
    %32 = arith.subf %18, %31 : vector<128x128xf32>
    %33 = vector.shape_cast %32 : vector<128x128xf32> to vector<1x128x128xf32>
    %c0_17 = arith.constant 0 : index
    %c0_18 = arith.constant 0 : index
    %c0_19 = arith.constant 0 : index
    %34 = vector.load %arg9[%c0_17, %c0_18, %c0_19] : memref<1x4x128xf32, #tpu.memory_space<vmem>>, vector<1x4x128xf32>
    %35 = vector.shape_cast %34 : vector<1x4x128xf32> to vector<4x128xf32>
    %36 = vector.shape_cast %35 : vector<4x128xf32> to vector<4x128x1xf32>
    %37 = vector.broadcast %33 : vector<1x128x128xf32> to vector<4x128x128xf32>
    %38 = vector.broadcast %36 : vector<4x128x1xf32> to vector<4x128x128xf32>
    %39 = arith.addf %37, %38 : vector<4x128x128xf32>
    %c0_20 = arith.constant 0 : index
    %c0_21 = arith.constant 0 : index
    %c0_22 = arith.constant 0 : index
    %40 = vector.load %arg10[%c0_20, %c0_21, %c0_22] : memref<1x4x128xf32, #tpu.memory_space<vmem>>, vector<1x4x128xf32>
    %41 = vector.shape_cast %40 : vector<1x4x128xf32> to vector<4x128xf32>
    %42 = vector.shape_cast %41 : vector<4x128xf32> to vector<4x1x128xf32>
    %43 = vector.broadcast %42 : vector<4x1x128xf32> to vector<4x128x128xf32>
    %44 = arith.addf %39, %43 : vector<4x128x128xf32>
    %c0_23 = arith.constant 0 : index
    %c0_24 = arith.constant 0 : index
    %c0_25 = arith.constant 0 : index
    %c0_26 = arith.constant 0 : index
    %45 = vector.load %arg11[%c0_23, %c0_24, %c0_25, %c0_26] : memref<1x4x128x128xf32, #tpu.memory_space<vmem>>, vector<1x4x128x128xf32>
    %46 = vector.shape_cast %45 : vector<1x4x128x128xf32> to vector<4x128x128xf32>
    %47 = vector.shape_cast %44 : vector<4x128x128xf32> to vector<1x4x128x128xf32>
    tpu.vector_store %arg11[%c0_23, %c0_24, %c0_25, %c0_26], %47 {strides = array<i32>} : memref<1x4x128x128xf32, #tpu.memory_space<vmem>>, vector<1x4x128x128xf32>,
    return
  }
  func.func @transform_0(%arg0: i32, %arg1: i32, %arg2: i32) -> (i32, i32, i32) {
    %c0_i32 = arith.constant 0 : i32
    %c0_i32_0 = arith.constant 0 : i32
    return %arg0, %arg1, %c0_i32 : i32, i32, i32
  }
  func.func @transform_1(%arg0: i32, %arg1: i32, %arg2: i32) -> (i32, i32) {
    %c0_i32 = arith.constant 0 : i32
    %c0_i32_0 = arith.constant 0 : i32
    %c0_i32_1 = arith.constant 0 : i32
    return %c0_i32, %c0_i32_0 : i32, i32
  }
  func.func @transform_2(%arg0: i32, %arg1: i32, %arg2: i32) -> (i32, i32) {
    %c0_i32 = arith.constant 0 : i32
    %c0_i32_0 = arith.constant 0 : i32
    %c0_i32_1 = arith.constant 0 : i32
    return %c0_i32, %c0_i32_0 : i32, i32
  }
  func.func @transform_3(%arg0: i32, %arg1: i32, %arg2: i32) -> (i32, i32) {
    %c0_i32 = arith.constant 0 : i32
    %c0_i32_0 = arith.constant 0 : i32
    return %arg1, %c0_i32 : i32, i32
  }
  func.func @transform_4(%arg0: i32, %arg1: i32, %arg2: i32) -> (i32, i32) {
    %c0_i32 = arith.constant 0 : i32
    %c0_i32_0 = arith.constant 0 : i32
    return %arg1, %c0_i32 : i32, i32
  }
  func.func @transform_5(%arg0: i32, %arg1: i32, %arg2: i32) -> (i32, i32, i32) {
    %c0_i32 = arith.constant 0 : i32
    %c0_i32_0 = arith.constant 0 : i32
    return %arg0, %arg2, %c0_i32 : i32, i32, i32
  }
  func.func @transform_6(%arg0: i32, %arg1: i32, %arg2: i32) -> (i32, i32, i32) {
    %c0_i32 = arith.constant 0 : i32
    %c0_i32_0 = arith.constant 0 : i32
    return %arg0, %c0_i32, %arg1 : i32, i32, i32
  }
  func.func @transform_7(%arg0: i32, %arg1: i32, %arg2: i32) -> (i32, i32, i32) {
    %c0_i32 = arith.constant 0 : i32
    %c0_i32_0 = arith.constant 0 : i32
    return %arg0, %c0_i32, %arg2 : i32, i32, i32
  }
  func.func @transform_8(%arg0: i32, %arg1: i32, %arg2: i32) -> (i32, i32, i32, i32) {
    %c0_i32 = arith.constant 0 : i32
    %c0_i32_0 = arith.constant 0 : i32
    return %arg0, %c0_i32, %arg1, %arg2 : i32, i32, i32, i32
  }
}

</mosaic_0001>

<bundles_post_ra>
// kernel: tpu_custom_call.1
= control target key start
LH: loop header
LB: loop body
LE: loop exit
PB: predicated region body
PF: predicated region fallthrough
CT: control target
= control target key end

     0   :  { %13 = vsyncpa [#allocation3], 0  ;;  %s3378_s0 = inlined_call_operand.vmem [shape: f32[2,128,32], index: 0, kind: input, shape index: {}]   ;;  %s3379_s1 = inlined_call_operand.vmem [shape: f32[32,32], index: 1, kind: input, shape index: {}]   ;;  %s3380_s2 = inlined_call_operand.vmem [shape: f32[1,32], index: 2, kind: input, shape index: {}]   ;;  %s3381_s3 = inlined_call_operand.vmem [shape: f32[128,16], index: 3, kind: input, shape index: {}]   ;;  %s3382_s4 = inlined_call_operand.vmem [shape: f32[128,16], index: 4, kind: input, shape index: {}]   ;;  %s3383_s5 = inlined_call_operand.vmem [shape: f32[2,128,16], index: 5, kind: input, shape index: {}]   ;;  %s3384_s6 = inlined_call_operand.vmem [shape: f32[2,4,128], index: 6, kind: input, shape index: {}]   ;;  %s3385_s7 = inlined_call_operand.vmem [shape: f32[2,4,128], index: 7, kind: input, shape index: {}]   ;;  %s3386_s8 = inlined_call_operand.hbm [shape: f32[2,4,128,128], index: 8, kind: output, shape index: {}]  }
   0x1   :  { %15 = vsyncpa [#allocation3 + $0x1], 0  ;;  %s2439_s27 = smov 0   ;;  %s2441_s28 = smov 0  }
   0x2   :  { %s2443_s29 = smov 0   ;;  %s2445_s30 = smov 0  }
   0x3   :  { %s2447_s9 = smov 0   ;;  %s2449_s10 = smov 0  }
   0x4 LB: > { %s1988_s11 = sadd.s32 4294967295, %s2385_s10   ;;  %s1989_s12 = sadd.s32 4294967294, %s2385_s10   ;;  %s2385_s10 = sphi %s2449_s10, %s21_s10   ;;  %s2381_s9 = sphi %s2447_s9, %s3432_s9   ;;  %s2377_s30 = sphi %s2445_s30, %s3431_s30   ;;  %s2373_s29 = sphi %s2443_s29, %s3430_s29   ;;  %s2369_s28 = sphi %s2441_s28, %s3429_s28   ;;  %s2365_s27 = sphi %s2439_s27, %s3428_s27  }
   0x5   : > { %s40_s13 = sadd.s32 1, %s2381_s9  ;;  %s257_s14 = sadd.s32 1, %s2373_s29 }
   0x6   : > { %p42_p0 = scmp.ge.s32.totalorder %s40_s13, 2  ;;  %p267_p1 = scmp.ne.s32.totalorder %s2373_s29, %s2369_s28 }
   0x7   : > { %p268_p2 = scmp.eq.s32.totalorder %s1988_s11, 1  ;;  %p273_p3 = scmp.ne.s32.totalorder %s2369_s28, %s2365_s27 }
   0x8   : > { %s3434_s13 = smov (%p42_p0, %s40_s13), 0  ;;  %p274_p5 = scmp.eq.s32.totalorder %s1989_s12, 1 }
   0x9   : > { %p2479_p4 = por %p268_p2, %p267_p1  ;;  %s250_s16 = ssub.s32 %s2381_s9, %s3434_s13 }
   0xa   : > { %p1994_p6 = scmp.ge.s32.totalorder %s2385_s10, 1  ;;  %p255_p7 = scmp.eq.s32.totalorder %s250_s16, 0 }
   0xb   : > { %p2486_p8 = por %p274_p5, %p273_p3  ;;  %p362_p9 = scmp.lt.s32.totalorder %s2385_s10, 3 }
   0xc   : > { %s2492_s18 = scalar_select %p255_p7, %s2373_s29, %s257_s14  }
   0xd   : > { %p363_p10 = pnand %p1994_p6, %p362_p9 }
   0xf   : > { %366 = sbr.rel (%p363_p10) target bundleno = 609 (0x261), region = 52 }
  0x14   : > { %v499_v0 = vld [vmem:[%s3379_s1 + $0x18] sm:$0xff]  ;;  %v498_v1 = vld [vmem:[%s3379_s1 + $0x10] sm:$0xff]  ;;  %p434_p11 = scmp.lt.s32.totalorder %s2377_s30, 1  ;;  %v1185_v2 = vlaneseq  ;;  %v497_v4 = vld [vmem:[%s3379_s1 + $0x8] sm:$0xff]  ;;  %v2387_v5 = vmov 1966171168  }
  0x15   : > { %2128 = vmatprep.subr.mxu0 %v499_v0  ;;  %v739_v3 = vld [vmem:[%s3382_s4 + $0x30] sm:$0xff]  ;;  %v1647_v6 = vunpack.c.l.s4 %v2387_v5  ;;  %s2388_s12 = smov 16   ;;  %v740_v7 = vld [vmem:[%s3382_s4 + $0x38] sm:$0xff]  ;;  %v741_v8 = vld [vmem:[%s3382_s4 + $0x40] sm:$0xff]  ;;  %vm507_vm0 = vcmask 261120   ;;  %vm925_vm1 = vcmask 130048  }
  0x16   : > { %2129 = vmatpush3.msra.mxu0 %v499_v0  ;;  %s2508_s11 = scalar_select %p434_p11, %s2377_s30, 1  ;;  %777 = vrot.lane.b32.xlu0 %v739_v3, %s2388_s12  ;;  %v496_v9 = vld [vmem:[%s3379_s1] sm:$0xff]  ;;  %v2531_v10 = vshrl.u32 %v1185_v2, 7  ;;  %v742_v14 = vld [vmem:[%s3382_s4 + $0x48] sm:$0xff]  ;;  %v743_v23 = vld [vmem:[%s3382_s4 + $0x50] sm:$0xff] }
  0x17   : > { %2130 = vmatprep.subr.mxu0 %v498_v1  ;;  %781 = vrot.lane.b32.xlu1 %v741_v8, %s2388_s12  ;;  %v1648_v11 = vunpack.c.0.s8 %v1647_v6  ;;  %v733_v18 = vld [vmem:[%s3382_s4] sm:$0xff]  ;;  %v734_v28 = vld [vmem:[%s3382_s4 + $0x8] sm:$0xff]  ;;  %v744_v33 = vld [vmem:[%s3382_s4 + $0x58] sm:$0xff] }
  0x18   : > { %2131 = vmatpush3.msra.mxu0 %v498_v1  ;;  %s2073_s23 = sshll.u32 %s2508_s11, 7  ;;  %s2000_s14 = sshll.u32 %s2508_s11, 2  ;;  %v2551_v19 = vsub.s32 0, %v2531_v10  ;;  %v735_v36 = vld [vmem:[%s3382_s4 + $0x10] sm:$0xff]  ;;  %v745_v38 = vld [vmem:[%s3382_s4 + $0x60] sm:$0xff]  ;;  %v736_v40 = vld [vmem:[%s3382_s4 + $0x18] sm:$0xff] }
  0x19   : > { %2132 = vmatprep.subr.mxu0 %v497_v4  ;;  %s2527_s26 = scalar_lea.vmem %s3378_s0, %s2073_s23  ;;  %s478_s20 = scalar_lea.vmem %s3385_s7, %s2000_s14  ;;  %v1651_v16 = vsub.s32 %v1648_v11, %v2531_v10  ;;  %v746_v42 = vld [vmem:[%s3382_s4 + $0x68] sm:$0xff]  ;;  %v737_v44 = vld [vmem:[%s3382_s4 + $0x20] sm:$0xff]  ;;  %v747_v46 = vld [vmem:[%s3382_s4 + $0x70] sm:$0xff] }
  0x1a   : > { %2133 = vmatpush3.msra.mxu0 %v497_v4  ;;  %v480_v12 = vld [vmem:[%s2527_s26] sm:$0xff]  ;;  %v481_v13 = vld [vmem:[%s2527_s26 + $0x8] sm:$0xff]  ;;  %779 = vrot.lane.b32.xlu0 %v740_v7, %s2388_s12  ;;  %v482_v17 = vld [vmem:[%s2527_s26 + $0x10] sm:$0xff]  ;;  %s2644_s21 = scalar_lea.vmem %s3383_s5, %s2073_s23  ;;  %s471_s25 = scalar_lea.vmem %s3384_s6, %s2000_s14 }
  0x1b   : > { %2134 = vmatprep.subr.mxu0 %v496_v9  ;;  %2136 = vmatprep.mubr.msk.f32.mxu0 %vm507_vm0, %v480_v12  ;;  %v2067_v15 = vld.sshfl [vmem:[%s478_s20] sm:$0x33 pattern:$0x75316420]  ;;  %v483_v22 = vld [vmem:[%s2527_s26 + $0x18] sm:$0xff]  ;;  %v485_v32 = vld [vmem:[%s2527_s26 + $0x28] sm:$0xff] }
  0x1c   : > { %2135 = vmatpush3.msra.mxu0 %v496_v9  ;;  %v1645_v20 = vcombine.high %v2067_v15, %v2067_v15  ;;  %v1652_v21 = vrot.slane %v2067_v15, %v1651_v16  ;;  %783 = vrot.lane.b32.xlu1 %v742_v14, %s2388_s12  ;;  %v484_v27 = vld [vmem:[%s2527_s26 + $0x20] sm:$0xff]  ;;  %v486_v35 = vld [vmem:[%s2527_s26 + $0x30] sm:$0xff]  ;;  %v487_v37 = vld [vmem:[%s2527_s26 + $0x38] sm:$0xff] }
  0x1d   : > { %2137 = vmatmul.mubr.msk.f32.vlgmr.msra.gmra.mxu0 %vm507_vm0, %v481_v13  ;;  %v488_v39 = vld [vmem:[%s2527_s26 + $0x40] sm:$0xff]  ;;  %v489_v41 = vld [vmem:[%s2527_s26 + $0x48] sm:$0xff]  ;;  %v490_v43 = vld [vmem:[%s2527_s26 + $0x50] sm:$0xff] }
  0x1e   : > { %2139 = vmatprep.mubr.msk.f32.mxu0 %vm507_vm0, %v482_v17  ;;  %765 = vrot.lane.b32.xlu0 %v733_v18, %s2388_s12  ;;  %v1659_v24 = vrot.slane %v1645_v20, %v1651_v16  ;;  %v1660_v25 = vcombine.high %v1652_v21, %v1652_v21  ;;  %v2562_v26 = vrot.slane %v1652_v21, %v2551_v19  ;;  %v491_v45 = vld [vmem:[%s2527_s26 + $0x58] sm:$0xff]  ;;  %v492_v47 = vld [vmem:[%s2527_s26 + $0x60] sm:$0xff]  ;;  %v738_v48 = vld [vmem:[%s3382_s4 + $0x28] sm:$0xff] }
  0x1f   : > { %v493_v49 = vld [vmem:[%s2527_s26 + $0x68] sm:$0xff]  ;;  %v748_v50 = vld [vmem:[%s3382_s4 + $0x78] sm:$0xff]  ;;  %v494_v51 = vld [vmem:[%s2527_s26 + $0x70] sm:$0xff] }
  0x20   : > { %v1661_v29 = vcombine.high %v1659_v24, %v1659_v24  ;;  %v2569_v30 = vrot.slane %v1659_v24, %v2551_v19  ;;  %v2572_v31 = vrot.slane %v1660_v25, %v2551_v19  ;;  %785 = vrot.lane.b32.xlu1 %v743_v23, %s2388_s12  ;;  %v495_v52 = vld [vmem:[%s2527_s26 + $0x78] sm:$0xff]  ;;  %v923_v54 = vld [vmem:[%s2644_s21 + $0x70] sm:$0xff]  ;;  %v922_v55 = vld [vmem:[%s2644_s21 + $0x68] sm:$0xff]  ;;  %s2389_s26 = smov 112  }
  0x21   : > { %2140 = vmatmul.mubr.msk.f32.gmra.mxu0 %vm507_vm0, %v483_v22  ;;  %v924_v53 = vld [vmem:[%s2644_s21 + $0x78] sm:$0xff]  ;;  %v921_v56 = vld [vmem:[%s2644_s21 + $0x60] sm:$0xff]  ;;  %v919_v58 = vld [vmem:[%s2644_s21 + $0x50] sm:$0xff] }
  0x22   : > { %2142 = vmatprep.mubr.msk.f32.mxu0 %vm507_vm0, %v484_v27  ;;  %767 = vrot.lane.b32.xlu0 %v734_v28, %s2388_s12  ;;  %v2583_v34 = vrot.slane %v1661_v29, %v2551_v19  ;;  %v920_v57 = vld [vmem:[%s2644_s21 + $0x58] sm:$0xff]  ;;  %v918_v59 = vld [vmem:[%s2644_s21 + $0x48] sm:$0xff]  ;;  %v917_v60 = vld [vmem:[%s2644_s21 + $0x40] sm:$0xff] }
  0x23   : > { %2160 = vmatprep.subr.msk.mxu0 %vm925_vm1, %v924_v53  ;;  %2216 = vmatprep.subr.msk.mxu1 %vm925_vm1, %v924_v53  ;;  %v916_v61 = vld [vmem:[%s2644_s21 + $0x38] sm:$0xff]  ;;  %v915_v62 = vld [vmem:[%s2644_s21 + $0x30] sm:$0xff]  ;;  %v914_v63 = vld [vmem:[%s2644_s21 + $0x28] sm:$0xff] }
  0x24   : > { %787 = vrot.lane.b32.xlu1 %v744_v33, %s2388_s12  ;;  %2161 = vmatpush3.xpose.msk.msra.mxu0 %vm925_vm1, %v924_v53  ;;  %v913_v0 = vld [vmem:[%s2644_s21 + $0x20] sm:$0xff]  ;;  %v912_v1 = vld [vmem:[%s2644_s21 + $0x18] sm:$0xff]  ;;  %v911_v3 = vld [vmem:[%s2644_s21 + $0x10] sm:$0xff] }
  0x25   : > { %2143 = vmatmul.mubr.msk.f32.gmra.mxu0 %vm507_vm0, %v485_v32  ;;  %2232 = vmatpush3.xpose.msk.msra.mxu1 %vm925_vm1, %v924_v53  ;;  %v910_v4 = vld [vmem:[%s2644_s21 + $0x8] sm:$0xff]  ;;  %v909_v7 = vld [vmem:[%s2644_s21] sm:$0xff]  ;;  %s2391_s21 = smov [#allocation2]  }
  0x26   : > { %2145 = vmatprep.mubr.msk.f32.mxu0 %vm507_vm0, %v486_v35  ;;  %769 = vrot.lane.b32.xlu0 %v735_v36, %s2388_s12  ;;  %v2729_v11 = vld [vmem:[%s3380_s2] ss:$0 sm:$0xff] }
  0x27   : > { %2162 = vmatprep.subr.msk.mxu0 %vm925_vm1, %v923_v54  ;;  %2217 = vmatprep.subr.msk.mxu1 %vm925_vm1, %v923_v54 }
  0x28   : > { %789 = vrot.lane.b32.xlu1 %v745_v38, %s2388_s12  ;;  %2163 = vmatpush3.xpose.msk.msra.mxu0 %vm925_vm1, %v923_v54 }
  0x29   : > { %2146 = vmatmul.mubr.msk.f32.gmra.mxu0 %vm507_vm0, %v487_v37  ;;  %2233 = vmatpush3.xpose.msk.msra.mxu1 %vm925_vm1, %v923_v54 }
  0x2a   : > { %2148 = vmatprep.mubr.msk.f32.mxu0 %vm507_vm0, %v488_v39  ;;  %771 = vrot.lane.b32.xlu0 %v736_v40, %s2388_s12 }
  0x2b   : > { %2164 = vmatprep.subr.msk.mxu0 %vm925_vm1, %v922_v55  ;;  %2218 = vmatprep.subr.msk.mxu1 %vm925_vm1, %v922_v55 }
  0x2c   : > { %791 = vrot.lane.b32.xlu1 %v746_v42, %s2388_s12  ;;  %2165 = vmatpush3.xpose.msk.msra.mxu0 %vm925_vm1, %v922_v55 }
  0x2d   : > { %2149 = vmatmul.mubr.msk.f32.gmra.mxu0 %vm507_vm0, %v489_v41  ;;  %2234 = vmatpush3.xpose.msk.msra.mxu1 %vm925_vm1, %v922_v55 }
  0x2e   : > { %2151 = vmatprep.mubr.msk.f32.mxu0 %vm507_vm0, %v490_v43  ;;  %773 = vrot.lane.b32.xlu0 %v737_v44, %s2388_s12 }
  0x2f   : > { %2166 = vmatprep.subr.msk.mxu0 %vm925_vm1, %v921_v56  ;;  %2219 = vmatprep.subr.msk.mxu1 %vm925_vm1, %v921_v56 }
  0x30   : > { %793 = vrot.lane.b32.xlu1 %v747_v46, %s2388_s12  ;;  %2167 = vmatpush3.xpose.msk.msra.mxu0 %vm925_vm1, %v921_v56 }
  0x31   : > { %2152 = vmatmul.mubr.msk.f32.gmra.mxu0 %vm507_vm0, %v491_v45  ;;  %2235 = vmatpush3.xpose.msk.msra.mxu1 %vm925_vm1, %v921_v56 }
  0x32   : > { %2154 = vmatprep.mubr.msk.f32.mxu0 %vm507_vm0, %v492_v47  ;;  %775 = vrot.lane.b32.xlu0 %v738_v48, %s2388_s12 }
  0x33   : > { %2168 = vmatprep.subr.msk.mxu0 %vm925_vm1, %v920_v57  ;;  %2220 = vmatprep.subr.msk.mxu1 %vm925_vm1, %v920_v57 }
  0x34   : > { %795 = vrot.lane.b32.xlu1 %v748_v50, %s2388_s12  ;;  %2169 = vmatpush3.xpose.msk.msra.mxu0 %vm925_vm1, %v920_v57  ;;  %s2313_s12 = sshll.u32 %s2391_s21, 4  ;;  %s2314_s12 = int_to_ptr.vmem [resolvable:$false] %s2313_s12 }
  0x35   : > { %2155 = vmatmul.mubr.msk.f32.gmra.mxu0 %vm507_vm0, %v493_v49  ;;  %2236 = vmatpush3.xpose.msk.msra.mxu1 %vm925_vm1, %v920_v57  ;;  %s2315_s23 = scalar_lea.vmem %s2314_s12, 16384 }
  0x36   : > { %2157 = vmatprep.mubr.msk.f32.mxu0 %vm507_vm0, %v494_v51  ;;  %2170 = vmatprep.subr.msk.mxu0 %vm925_vm1, %v919_v58 }
  0x37   : > { %2221 = vmatprep.subr.msk.mxu1 %vm925_vm1, %v919_v58 }
  0x38   : > { %2171 = vmatpush3.xpose.msk.msra.mxu0 %vm925_vm1, %v919_v58 }
  0x39   : > { %2158 = vmatmul.mubr.msk.f32.gmra.mxu0 %vm507_vm0, %v495_v52  ;;  %2237 = vmatpush3.xpose.msk.msra.mxu1 %vm925_vm1, %v919_v58 }
  0x3a   : > { %2172 = vmatprep.subr.msk.mxu0 %vm925_vm1, %v918_v59  ;;  %2222 = vmatprep.subr.msk.mxu1 %vm925_vm1, %v918_v59 }
  0x3c   : > { %2173 = vmatpush3.xpose.msk.msra.mxu0 %vm925_vm1, %v918_v59 }
  0x3d   : > { %2238 = vmatpush3.xpose.msk.msra.mxu1 %vm925_vm1, %v918_v59  ;;  %2174 = vmatprep.subr.msk.mxu0 %vm925_vm1, %v917_v60 }
  0x3e   : > { %2223 = vmatprep.subr.msk.mxu1 %vm925_vm1, %v917_v60 }
  0x40   : > { %2175 = vmatpush3.xpose.msk.msra.mxu0 %vm925_vm1, %v917_v60 }
  0x41   : > { %2239 = vmatpush3.xpose.msk.msra.mxu1 %vm925_vm1, %v917_v60  ;;  %2176 = vmatprep.subr.msk.mxu0 %vm925_vm1, %v916_v61 }
  0x42   : > { %2224 = vmatprep.subr.msk.mxu1 %vm925_vm1, %v916_v61 }
  0x44   : > { %2177 = vmatpush3.xpose.msk.msra.mxu0 %vm925_vm1, %v916_v61 }
  0x45   : > { %2240 = vmatpush3.xpose.msk.msra.mxu1 %vm925_vm1, %v916_v61  ;;  %2178 = vmatprep.subr.msk.mxu0 %vm925_vm1, %v915_v62 }
  0x46   : > { %2225 = vmatprep.subr.msk.mxu1 %vm925_vm1, %v915_v62 }
  0x48   : > { %2179 = vmatpush3.xpose.msk.msra.mxu0 %vm925_vm1, %v915_v62 }
  0x49   : > { %2241 = vmatpush3.xpose.msk.msra.mxu1 %vm925_vm1, %v915_v62  ;;  %2180 = vmatprep.subr.msk.mxu0 %vm925_vm1, %v914_v63 }
  0x4a   : > { %2226 = vmatprep.subr.msk.mxu1 %vm925_vm1, %v914_v63 }
  0x4c   : > { %2181 = vmatpush3.xpose.msk.msra.mxu0 %vm925_vm1, %v914_v63 }
  0x4d   : > { %2242 = vmatpush3.xpose.msk.msra.mxu1 %vm925_vm1, %v914_v63  ;;  %2182 = vmatprep.subr.msk.mxu0 %vm925_vm1, %v913_v0 }
  0x4e   : > { %2227 = vmatprep.subr.msk.mxu1 %vm925_vm1, %v913_v0 }
  0x50   : > { %2183 = vmatpush3.xpose.msk.msra.mxu0 %vm925_vm1, %v913_v0 }
  0x51   : > { %2243 = vmatpush3.xpose.msk.msra.mxu1 %vm925_vm1, %v913_v0  ;;  %2184 = vmatprep.subr.msk.mxu0 %vm925_vm1, %v912_v1 }
  0x52   : > { %2228 = vmatprep.subr.msk.mxu1 %vm925_vm1, %v912_v1 }
  0x54   : > { %2185 = vmatpush3.xpose.msk.msra.mxu0 %vm925_vm1, %v912_v1 }
  0x55   : > { %2244 = vmatpush3.xpose.msk.msra.mxu1 %vm925_vm1, %v912_v1  ;;  %2186 = vmatprep.subr.msk.mxu0 %vm925_vm1, %v911_v3 }
  0x56   : > { %2229 = vmatprep.subr.msk.mxu1 %vm925_vm1, %v911_v3 }
  0x58   : > { %2187 = vmatpush3.xpose.msk.msra.mxu0 %vm925_vm1, %v911_v3 }
  0x59   : > { %2245 = vmatpush3.xpose.msk.msra.mxu1 %vm925_vm1, %v911_v3  ;;  %2188 = vmatprep.subr.msk.mxu0 %vm925_vm1, %v910_v4 }
  0x5a   : > { %2230 = vmatprep.subr.msk.mxu1 %vm925_vm1, %v910_v4 }
  0x5c   : > { %2189 = vmatpush3.xpose.msk.msra.mxu0 %vm925_vm1, %v910_v4 }
  0x5d   : > { %2246 = vmatpush3.xpose.msk.msra.mxu1 %vm925_vm1, %v910_v4  ;;  %2190 = vmatprep.subr.msk.mxu0 %vm925_vm1, %v909_v7 }
  0x5e   : > { %2231 = vmatprep.subr.msk.mxu1 %vm925_vm1, %v909_v7 }
  0x60   : > { %2191 = vmatpush3.xpose.msk.msra.mxu0 %vm925_vm1, %v909_v7 }
  0x61   : > { %2247 = vmatpush3.xpose.msk.msra.mxu1 %vm925_vm1, %v909_v7 }
  0x88   : > { %v778_v5 = vpop.permute.xlu0 %777 }
  0x89   : > { %v782_v9 = vpop.permute.xlu1 %781 }
  0x8c   : > { %v780_v6 = vpop.permute.xlu0 %779 }
  0x8e   : > { %v784_v18 = vpop.permute.xlu1 %783 }
  0x90   : > { %v766_v8 = vpop.permute.xlu0 %765 }
  0x92   : > { %v786_v24 = vpop.permute.xlu1 %785 }
  0x94   : > { %v768_v14 = vpop.permute.xlu0 %767 }
  0x96   : > { %v788_v35 = vpop.permute.xlu1 %787 }
  0x98   : > { %v770_v36 = vpop.permute.xlu0 %769 }
  0x9a   : > { %v790_v47 = vpop.permute.xlu1 %789 }
  0x9c   : > { %v772_v48 = vpop.permute.xlu0 %771 }
  0x9e   : > { %v792_v58 = vpop.permute.xlu1 %791 }
  0xa0   : > { %v774_v59 = vpop.permute.xlu0 %773 }
  0xdd   : > { %v2138_v12 = vpop.f32.mrf.mxu0 }
  0xde   : > { %v2732_v13 = vadd.f32 %v2138_v12, %v2729_v11  ;;  %v2808_v12 = vld [vmem:[%s471_s25] sm:$0xf]  ;;  %s2075_s25 = sshll.u32 %s2377_s30, 13 }
  0xdf   : > { %v622_v15 = vpop.f32.mrf.mxu0  ;;  %s3319_s16 = scalar_lea.hbm %s3386_s8, %s2075_s25 }
  0xe0   : > { %v814_v16 = vmul.f32 %v768_v14, %v2732_v13  ;;  %v2736_v17 = vadd.f32 %v2729_v11, %v622_v15 }
  0xe1   : > { %v2141_v20 = vpop.f32.mrf.mxu0 }
  0xe2   : > { %847 = vrot.lane.b32.xlu0 %v814_v16, %s2389_s26  ;;  %v813_v22 = vmul.f32 %v766_v8, %v2736_v17  ;;  %v2772_v53 = vadd.f32 %v2141_v20, %v2729_v11 }
  0xe3   : > { %v632_v21 = vpop.f32.mrf.mxu0 }
  0xe4   : > { %v2759_v44 = vadd.f32 %v2729_v11, %v632_v21  ;;  %v816_v61 = vmul.f32 %v772_v48, %v2772_v53  ;;  %v1440_v21 = vsub.s32 2, %v2531_v10  ;;  %v710_v48 = vld [vmem:[%s3381_s3 + $0x48] sm:$0xff] }
  0xe5   : > { %v2144_v23 = vpop.f32.mrf.mxu0 }
  0xe6   : > { %845 = vrot.lane.b32.xlu0 %v813_v22, %s2389_s26  ;;  %v815_v54 = vmul.f32 %v770_v36, %v2759_v44  ;;  %v2792_v3 = vadd.f32 %v2144_v23, %v2729_v11  ;;  %v1441_v22 = vrot.slane %v2808_v12, %v1440_v21 }
  0xe7   : > { %v642_v25 = vpop.f32.mrf.mxu0 }
  0xe8   : > { %v2783_v62 = vadd.f32 %v2729_v11, %v642_v25  ;;  %v702_v25 = vld [vmem:[%s3381_s3 + $0x8] sm:$0xff] }
  0xe9   : > { %v2147_v27 = vpop.f32.mrf.mxu0 }
  0xea   : > { %v2742_v28 = vadd.f32 %v2147_v27, %v2729_v11  ;;  %v817_v4 = vmul.f32 %v774_v59, %v2783_v62 }
  0xeb   : > { %v652_v29 = vpop.f32.mrf.mxu0 }
  0xec   : > { %v820_v32 = vmul.f32 %v780_v6, %v2742_v28  ;;  %v2746_v33 = vadd.f32 %v2729_v11, %v652_v29  ;;  %v794_v6 = vpop.permute.xlu1 %793  ;;  %v718_v29 = vmul.f32 %v702_v25, %v2732_v13 }
  0xed   : > { %v2150_v37 = vpop.f32.mrf.mxu0 }
  0xee   : > { %v819_v38 = vmul.f32 %v778_v5, %v2746_v33  ;;  %v2750_v39 = vadd.f32 %v2150_v37, %v2729_v11  ;;  %859 = vrot.lane.b32.xlu1 %v820_v32, %s2389_s26  ;;  %v776_v5 = vpop.permute.xlu0 %775  ;;  %v707_v37 = vld [vmem:[%s3381_s3 + $0x30] sm:$0xff] }
  0xef   : > { %v662_v40 = vpop.f32.mrf.mxu0 }
  0xf0   : > { %v822_v41 = vmul.f32 %v784_v18, %v2750_v39  ;;  %v2755_v42 = vadd.f32 %v2729_v11, %v662_v40  ;;  %857 = vrot.lane.b32.xlu0 %v819_v38, %s2389_s26  ;;  %v796_v16 = vpop.permute.xlu1 %795  ;;  %v1307_v18 = vrot.slane %v2808_v12, %v2551_v19  ;;  %v1373_v19 = vsub.s32 1, %v2531_v10 }
  0xf1   : > { %v2153_v43 = vpop.f32.mrf.mxu0  ;;  %v723_v38 = vmul.f32 %v707_v37, %v2746_v33  ;;  %v1507_v40 = vsub.s32 3, %v2531_v10 }
  0xf2   : > { %v821_v45 = vmul.f32 %v782_v9, %v2755_v42  ;;  %v2763_v46 = vadd.f32 %v2153_v43, %v2729_v11  ;;  %863 = vrot.lane.b32.xlu1 %v822_v41, %s2389_s26  ;;  %v818_v9 = vmul.f32 %v776_v5, %v2792_v3 }
  0xf3   : > { %v672_v49 = vpop.f32.mrf.mxu0 }
  0xf4   : > { %v824_v50 = vmul.f32 %v788_v35, %v2763_v46  ;;  %v2768_v51 = vadd.f32 %v2729_v11, %v672_v49  ;;  %861 = vrot.lane.b32.xlu0 %v821_v45, %s2389_s26  ;;  %v709_v45 = vld [vmem:[%s3381_s3 + $0x40] sm:$0xff] }
  0xf5   : > { %v2156_v52 = vpop.f32.mrf.mxu0  ;;  %v725_v33 = vmul.f32 %v709_v45, %v2755_v42  ;;  %v711_v42 = vld [vmem:[%s3381_s3 + $0x50] sm:$0xff] }
  0xf6   : > { %v2776_v55 = vadd.f32 %v2156_v52, %v2729_v11  ;;  %867 = vrot.lane.b32.xlu1 %v824_v50, %s2389_s26  ;;  %v823_v57 = vmul.f32 %v786_v24, %v2768_v51  ;;  %v701_v24 = vld [vmem:[%s3381_s3] sm:$0xff]  ;;  %v726_v52 = vmul.f32 %v710_v48, %v2750_v39  ;;  %v712_v39 = vld [vmem:[%s3381_s3 + $0x58] sm:$0xff] }
  0xf7   : > { %v682_v56 = vpop.f32.mrf.mxu0  ;;  %v717_v27 = vmul.f32 %v701_v24, %v2736_v17  ;;  %v708_v17 = vld [vmem:[%s3381_s3 + $0x38] sm:$0xff]  ;;  %v728_v5 = vmul.f32 %v712_v39, %v2763_v46  ;;  %v715_v24 = vld [vmem:[%s3381_s3 + $0x70] sm:$0xff] }
  0xf8   : > { %849 = vrot.lane.b32.xlu0 %v815_v54, %s2389_s26  ;;  %v826_v63 = vmul.f32 %v792_v58, %v2776_v55  ;;  %v2788_v0 = vadd.f32 %v2729_v11, %v682_v56  ;;  %v724_v41 = vmul.f32 %v708_v17, %v2742_v28  ;;  %v2852_v28 = vrot.slane %v2808_v12, %v1507_v40  ;;  %v703_v56 = vld [vmem:[%s3381_s3 + $0x10] sm:$0xff] }
  0xf9   : > { %v2159_v60 = vpop.f32.mrf.mxu0 }
  0xfa   : > { %865 = vrot.lane.b32.xlu1 %v823_v57, %s2389_s26  ;;  %v825_v7 = vmul.f32 %v790_v47, %v2788_v0  ;;  %v2811_v14 = vadd.f32 %v2159_v60, %v2729_v11  ;;  %v719_v60 = vmul.f32 %v703_v56, %v2759_v44 }
  0xfb   : > { %v692_v1 = vpop.f32.mrf.mxu0 }
  0xfc   : > { %851 = vrot.lane.b32.xlu0 %v816_v61, %s2389_s26  ;;  %v2803_v8 = vadd.f32 %v2729_v11, %v692_v1  ;;  %v828_v20 = vmul.f32 %v796_v16, %v2811_v14  ;;  %v1374_v11 = vrot.slane %v2808_v12, %v1373_v19  ;;  %v706_v19 = vld [vmem:[%s3381_s3 + $0x28] sm:$0xff] }
  0xfd   : > { %v722_v25 = vmul.f32 %v706_v19, %v2792_v3 }
  0xfe   : > { %871 = vrot.lane.b32.xlu1 %v826_v63, %s2389_s26  ;;  %v827_v15 = vmul.f32 %v794_v6, %v2803_v8  ;;  %v704_v63 = vld [vmem:[%s3381_s3 + $0x18] sm:$0xff] }
  0xff   : > { %v720_v44 = vmul.f32 %v704_v63, %v2772_v53  ;;  %v714_v53 = vld [vmem:[%s3381_s3 + $0x68] sm:$0xff] }
 0x100   : > { %853 = vrot.lane.b32.xlu0 %v817_v4, %s2389_s26  ;;  %v727_v4 = vmul.f32 %v711_v42, %v2768_v51  ;;  %v713_v51 = vld [vmem:[%s3381_s3 + $0x60] sm:$0xff] }
 0x101   : > { %v729_v21 = vmul.f32 %v713_v51, %v2788_v0 }
 0x102   : > { %869 = vrot.lane.b32.xlu1 %v825_v7, %s2389_s26 }
 0x104   : > { %855 = vrot.lane.b32.xlu0 %v818_v9, %s2389_s26 }
 0x106   : > { %873 = vrot.lane.b32.xlu1 %v827_v15, %s2389_s26  ;;  %v705_v15 = vld [vmem:[%s3381_s3 + $0x20] sm:$0xff] }
 0x108   : > { %1309 = vbcast.lane.b32.xlu0 %v1307_v18, 256 }
 0x10a   : > { %875 = vrot.lane.b32.xlu1 %v828_v20, %s2389_s26  ;;  %s430_s26 = sand.u32 1, %s2369_s28  }
 0x10b   : > { %s1995_s22 = sshll.u32 %s430_s26, 9  ;;  %s3333_s19 = scalar_lea.sflag [#allocation3], %s430_s26 }
 0x10c   : > { %1317 = vbcast.lane.b32.xlu0 %v1307_v18, 272  ;;  %s3091_s24 = scalar_lea.vmem [#allocation2], %s1995_s22 }
 0x10d   : > { %s1827_s11 = sshll.u32 %s3091_s24, 4  ;;  %s3321_s11 = int_to_ptr.vmem [resolvable:$true] %s1827_s11 }
 0x10e   : > { %1313 = vbcast.lane.b32.xlu1 %v1307_v18, 264  ;;  %s2309_s20 = scalar_lea.vmem %s3321_s11, 8192  ;;  %p2316_p1 = scmp.lt.s32.totalorder %s3321_s11, %s2314_s12 }
 0x10f   : > { %p2310_p12 = scmp.ne.s32.totalorder %s3321_s11, %s2309_s20  ;;  %p2317_p2 = scmp.lt.s32.totalorder %s2315_s23, %s2309_s20 }
 0x110   : > { %1325 = vbcast.lane.b32.xlu0 %v1307_v18, 288 }
 0x111   : > { %p2311_p13 = pnand %p2310_p12, %p2479_p4  ;;  %p2318_p3 = por %p2317_p2, %p2316_p1 }
 0x112   : > { %1321 = vbcast.lane.b32.xlu1 %v1307_v18, 280 }
 0x113   : > { %p2312_p0 = pneg %p2311_p13 }
 0x114   : > { %1333 = vbcast.lane.b32.xlu0 %v1307_v18, 304 }
 0x115   : > { %p2319_p5 = pnand %p2318_p3, %p2312_p0 }
 0x116   : > { %1329 = vbcast.lane.b32.xlu1 %v1307_v18, 296 }
 0x118   : > { %1341 = vbcast.lane.b32.xlu0 %v1307_v18, 320 }
 0x11a   : > { %1337 = vbcast.lane.b32.xlu1 %v1307_v18, 312 }
 0x11c   : > { %1349 = vbcast.lane.b32.xlu0 %v1307_v18, 336 }
 0x11e   : > { %1345 = vbcast.lane.b32.xlu1 %v1307_v18, 328 }
 0x120   : > { %1357 = vbcast.lane.b32.xlu0 %v1307_v18, 352 }
 0x122   : > { %1353 = vbcast.lane.b32.xlu1 %v1307_v18, 344 }
 0x124   : > { %1365 = vbcast.lane.b32.xlu0 %v1307_v18, 368 }
 0x126   : > { %1361 = vbcast.lane.b32.xlu1 %v1307_v18, 360 }
 0x128   : > { %1376 = vbcast.lane.b32.xlu0 %v1374_v11, 256 }
 0x12a   : > { %1369 = vbcast.lane.b32.xlu1 %v1307_v18, 376  ;;  %v721_v18 = vmul.f32 %v705_v15, %v2783_v62 }
 0x12c   : > { %1384 = vbcast.lane.b32.xlu0 %v1374_v11, 272 }
 0x12e   : > { %1380 = vbcast.lane.b32.xlu1 %v1374_v11, 264 }
 0x130   : > { %1392 = vbcast.lane.b32.xlu0 %v1374_v11, 288 }
 0x132   : > { %1388 = vbcast.lane.b32.xlu1 %v1374_v11, 280 }
 0x134   : > { %1400 = vbcast.lane.b32.xlu0 %v1374_v11, 304 }
 0x136   : > { %1396 = vbcast.lane.b32.xlu1 %v1374_v11, 296 }
 0x138   : > { %1408 = vbcast.lane.b32.xlu0 %v1374_v11, 320 }
 0x13a   : > { %1404 = vbcast.lane.b32.xlu1 %v1374_v11, 312 }
 0x13c   : > { %1416 = vbcast.lane.b32.xlu0 %v1374_v11, 336 }
 0x13e   : > { %1412 = vbcast.lane.b32.xlu1 %v1374_v11, 328 }
 0x140   : > { %1424 = vbcast.lane.b32.xlu0 %v1374_v11, 352 }
 0x142   : > { %1420 = vbcast.lane.b32.xlu1 %v1374_v11, 344 }
 0x144   : > { %1432 = vbcast.lane.b32.xlu0 %v1374_v11, 368 }
 0x146   : > { %1428 = vbcast.lane.b32.xlu1 %v1374_v11, 360 }
 0x148   : > { %1443 = vbcast.lane.b32.xlu0 %v1441_v22, 256 }
 0x14a   : > { %1436 = vbcast.lane.b32.xlu1 %v1374_v11, 376 }
 0x14c   : > { %1451 = vbcast.lane.b32.xlu0 %v1441_v22, 272 }
 0x14e   : > { %1447 = vbcast.lane.b32.xlu1 %v1441_v22, 264 }
 0x150   : > { %1459 = vbcast.lane.b32.xlu0 %v1441_v22, 288 }
 0x152   : > { %1455 = vbcast.lane.b32.xlu1 %v1441_v22, 280 }
 0x154   : > { %v848_v23 = vpop.permute.xlu0 %847  ;;  %1467 = vbcast.lane.b32.xlu0 %v1441_v22, 304 }
 0x155   : > { %v894_v36 = vadd.f32 %v848_v23, %v718_v29 }
 0x156   : > { %1463 = vbcast.lane.b32.xlu1 %v1441_v22, 296 }
 0x158   : > { %v846_v32 = vpop.permute.xlu0 %845  ;;  %1475 = vbcast.lane.b32.xlu0 %v1441_v22, 320 }
 0x159   : > { %v893_v35 = vadd.f32 %v846_v32, %v717_v27 }
 0x15a   : > { %1471 = vbcast.lane.b32.xlu1 %v1441_v22, 312 }
 0x15b   : > { %2192 = vmatprep.mubr.msk.f32.mxu0 %vm925_vm1, %v893_v35  ;;  %v716_v35 = vld [vmem:[%s3381_s3 + $0x78] sm:$0xff] }
 0x15c   : > { %2193 = vmatmul.mubr.msk.f32.vlgmr.msra.gmra.mxu0 %vm925_vm1, %v894_v36  ;;  %1483 = vbcast.lane.b32.xlu0 %v1441_v22, 336  ;;  %v732_v3 = vmul.f32 %v716_v35, %v2811_v14  ;;  %v1194_v35 = vadd.s32 64, %v2531_v10 }
 0x15e   : > { %1479 = vbcast.lane.b32.xlu1 %v1441_v22, 328 }
 0x160   : > { %v860_v13 = vpop.permute.xlu1 %859  ;;  %1491 = vbcast.lane.b32.xlu0 %v1441_v22, 352 }
 0x161   : > { %v900_v49 = vadd.f32 %v860_v13, %v724_v41 }
 0x162   : > { %v858_v43 = vpop.permute.xlu0 %857  ;;  %1487 = vbcast.lane.b32.xlu1 %v1441_v22, 344 }
 0x163   : > { %v899_v47 = vadd.f32 %v858_v43, %v723_v38 }
 0x164   : > { %v864_v50 = vpop.permute.xlu1 %863  ;;  %1499 = vbcast.lane.b32.xlu0 %v1441_v22, 368 }
 0x165   : > { %2201 = vmatprep.mubr.msk.f32.mxu1 %vm925_vm1, %v899_v47  ;;  %v902_v58 = vadd.f32 %v864_v50, %v726_v52 }
 0x166   : > { %2202 = vmatmul.mubr.msk.f32.vlgmr.msra.gmra.mxu1 %vm925_vm1, %v900_v49  ;;  %v862_v54 = vpop.permute.xlu0 %861  ;;  %1495 = vbcast.lane.b32.xlu1 %v1441_v22, 360 }
 0x167   : > { %v901_v57 = vadd.f32 %v862_v54, %v725_v33 }
 0x168   : > { %v868_v59 = vpop.permute.xlu1 %867  ;;  %1510 = vbcast.lane.b32.xlu0 %v2852_v28, 256 }
 0x169   : > { %2204 = vmatprep.mubr.msk.f32.mxu1 %vm925_vm1, %v901_v57  ;;  %v904_v9 = vadd.f32 %v868_v59, %v728_v5 }
 0x16a   : > { %2205 = vmatmul.mubr.msk.f32.gmra.mxu1 %vm925_vm1, %v902_v58  ;;  %v850_v61 = vpop.permute.xlu0 %849  ;;  %1503 = vbcast.lane.b32.xlu1 %v1441_v22, 376  ;;  %v730_v22 = vmul.f32 %v714_v53, %v2776_v55  ;;  %v731_v55 = vmul.f32 %v715_v24, %v2803_v8 }
 0x16b   : > { %v895_v1 = vadd.f32 %v850_v61, %v719_v60 }
 0x16c   : > { %v866_v6 = vpop.permute.xlu1 %865  ;;  %1518 = vbcast.lane.b32.xlu0 %v2852_v28, 272 }
 0x16d   : > { %v903_v7 = vadd.f32 %v866_v6, %v727_v4  ;;  %2195 = vmatprep.mubr.msk.f32.mxu0 %vm925_vm1, %v895_v1 }
 0x16e   : > { %v852_v12 = vpop.permute.xlu0 %851  ;;  %1514 = vbcast.lane.b32.xlu1 %v2852_v28, 264 }
 0x16f   : > { %v896_v16 = vadd.f32 %v852_v12, %v720_v44  ;;  %2207 = vmatprep.mubr.msk.f32.mxu1 %vm925_vm1, %v903_v7 }
 0x170   : > { %v872_v46 = vpop.permute.xlu1 %871  ;;  %2208 = vmatmul.mubr.msk.f32.gmra.mxu1 %vm925_vm1, %v904_v9  ;;  %1526 = vbcast.lane.b32.xlu0 %v2852_v28, 288 }
 0x171   : > { %2196 = vmatmul.mubr.msk.f32.gmra.mxu0 %vm925_vm1, %v896_v16  ;;  %v906_v27 = vadd.f32 %v872_v46, %v730_v22 }
 0x172   : > { %v854_v20 = vpop.permute.xlu0 %853  ;;  %1522 = vbcast.lane.b32.xlu1 %v2852_v28, 280 }
 0x173   : > { %v897_v11 = vadd.f32 %v854_v20, %v721_v18 }
 0x174   : > { %v870_v23 = vpop.permute.xlu1 %869  ;;  %1534 = vbcast.lane.b32.xlu0 %v2852_v28, 304 }
 0x175   : > { %v905_v62 = vadd.f32 %v870_v23, %v729_v21  ;;  %2198 = vmatprep.mubr.msk.f32.mxu0 %vm925_vm1, %v897_v11 }
 0x176   : > { %v856_v29 = vpop.permute.xlu0 %855  ;;  %1530 = vbcast.lane.b32.xlu1 %v2852_v28, 296 }
 0x177   : > { %v898_v32 = vadd.f32 %v856_v29, %v722_v25  ;;  %2210 = vmatprep.mubr.msk.f32.mxu1 %vm925_vm1, %v905_v62  ;;  %v1187_v25 = vadd.s32 8, %v2531_v10  ;;  %v1193_v29 = vadd.s32 56, %v2531_v10 }
 0x178   : > { %v874_v0 = vpop.permute.xlu1 %873  ;;  %2211 = vmatmul.mubr.msk.f32.gmra.mxu1 %vm925_vm1, %v906_v27  ;;  %1542 = vbcast.lane.b32.xlu0 %v2852_v28, 320  ;;  %v3020_v27 = vand.u32 127, %v1185_v2  ;;  %v1189_v2 = vadd.s32 24, %v2531_v10 }
 0x179   : > { %v907_v36 = vadd.f32 %v874_v0, %v731_v55  ;;  %2199 = vmatmul.mubr.msk.f32.gmra.mxu0 %vm925_vm1, %v898_v32  ;;  %v1192_v55 = vadd.s32 48, %v2531_v10  ;;  %v1195_v0 = vadd.s32 72, %v2531_v10 }
 0x17a   : > { %1538 = vbcast.lane.b32.xlu1 %v2852_v28, 312  ;;  %v2925_v13 = vpop.permute.xlu0 %1309  ;;  %vm1224_vm2 = vcmp.gt.s32.totalorder %v1187_v25, %v3020_v27  ;;  %vm1223_vm3 = vcmp.gt.s32.totalorder %v2531_v10, %v3020_v27  ;;  %vm1230_vm4 = vcmp.gt.s32.totalorder %v1193_v29, %v3020_v27  ;;  %vm1231_vm7 = vcmp.gt.s32.totalorder %v1194_v35, %v3020_v27 }
 0x17b   : > { %2213 = vmatprep.mubr.msk.f32.mxu1 %vm925_vm1, %v907_v36  ;;  %v1197_v36 = vadd.s32 88, %v2531_v10  ;;  %vm1229_vm5 = vcmp.gt.s32.totalorder %v1192_v55, %v3020_v27  ;;  %vm1232_vm6 = vcmp.gt.s32.totalorder %v1195_v0, %v3020_v27  ;;  %vm1226_vm9 = vcmp.gt.s32.totalorder %v1189_v2, %v3020_v27 }
 0x17c   : > { %v876_v37 = vpop.permute.xlu1 %875  ;;  %1550 = vbcast.lane.b32.xlu0 %v2852_v28, 336 }
 0x17d   : > { %v908_v8 = vadd.f32 %v876_v37, %v732_v3  ;;  %v3387_v37 = vmov 0.0   ;;  %vm1234_vm8 = vcmp.gt.s32.totalorder %v1197_v36, %v3020_v27 }
 0x17e   : > { %1546 = vbcast.lane.b32.xlu1 %v2852_v28, 328  ;;  %v2930_v38 = vpop.permute.xlu0 %1317  ;;  %v2051_v25 = vsel %vm1223_vm3, 1.0, %v3387_v37  ;;  %v2057_v29 = vsel %vm1229_vm5, 1.0, %v3387_v37  ;;  %v2062_v36 = vsel %vm1234_vm8, 1.0, %v3387_v37 }
 0x17f   : > { %2214 = vmatmul.mubr.msk.f32.gmra.mxu1 %vm925_vm1, %v908_v8  ;;  %v2052_v8 = vsel %vm1224_vm2, 1.0, %v3387_v37  ;;  %v1271_v0 = vmul.f32 1e+12, %v2051_v25 }
 0x180   : > { %1558 = vbcast.lane.b32.xlu0 %v2852_v28, 352  ;;  %v2922_v17 = vpop.permute.xlu1 %1313  ;;  %v1272_v55 = vmul.f32 1e+12, %v2052_v8  ;;  %v3054_v8 = vmul.f32 1e+12, %v2057_v29 }
 0x181   : > { %v3068_v29 = vmul.f32 1e+12, %v2062_v36 }
 0x182   : > { %1554 = vbcast.lane.b32.xlu1 %v2852_v28, 344  ;;  %v2934_v41 = vpop.permute.xlu0 %1325 }
 0x183   : > { %3392 = vst [vmem:[#allocation6_spill] sm:$0xff] %v2934_v41  ;;  %v1199_v41 = vadd.s32 104, %v2531_v10 }
 0x184   : > { %1566 = vbcast.lane.b32.xlu0 %v2852_v28, 368  ;;  %v2928_v14 = vpop.permute.xlu1 %1321 }
 0x185   : > { %vm1236_vm12 = vcmp.gt.s32.totalorder %v1199_v41, %v3020_v27 }
 0x186   : > { %1562 = vbcast.lane.b32.xlu1 %v2852_v28, 360  ;;  %v2938_v45 = vpop.permute.xlu0 %1333 }
 0x188   : > { %v2932_v40 = vpop.permute.xlu1 %1329 }
 0x189   : > { %3391 = vst [vmem:[#allocation5_spill] sm:$0xff] %v2932_v40 }
 0x18a   : > { %1570 = vbcast.lane.b32.xlu1 %v2852_v28, 376  ;;  %v2942_v48 = vpop.permute.xlu0 %1341 }
 0x18c   : > { %v2936_v43 = vpop.permute.xlu1 %1337 }
 0x18e   : > { %v2946_v50 = vpop.permute.xlu0 %1349 }
 0x190   : > { %v2940_v47 = vpop.permute.xlu1 %1345 }
 0x192   : > { %v2950_v28 = vpop.permute.xlu0 %1357 }
 0x193   : > { %3394 = vst [vmem:[#allocation8_spill] sm:$0xff] %v2950_v28 }
 0x194   : > { %v2944_v49 = vpop.permute.xlu1 %1353 }
 0x196   : > { %v2954_v54 = vpop.permute.xlu0 %1365 }
 0x197   : > { %3396 = vst [vmem:[#allocation10_spill] sm:$0xff] %v2954_v54  ;;  %v2060_v54 = vsel %vm1232_vm6, 1.0, %v3387_v37 }
 0x198   : > { %v2948_v33 = vpop.permute.xlu1 %1361  ;;  %v3056_v25 = vmul.f32 1e+12, %v2060_v54 }
 0x199   : > { %3393 = vst [vmem:[#allocation7_spill] sm:$0xff] %v2948_v33 }
 0x19a   : > { %v2958_v57 = vpop.permute.xlu0 %1376 }
 0x19c   : > { %v2952_v52 = vpop.permute.xlu1 %1369 }
 0x19d   : > { %3395 = vst [vmem:[#allocation9_spill] sm:$0xff] %v2952_v52 }
 0x19e   : > { %v2962_v59 = vpop.permute.xlu0 %1384 }
 0x1a0   : > { %v2956_v56 = vpop.permute.xlu1 %1380 }
 0x1a2   : > { %v2966_v39 = vpop.permute.xlu0 %1392 }
 0x1a3   : > { %3398 = vst [vmem:[#allocation12_spill] sm:$0xff] %v2966_v39  ;;  %v1188_v39 = vadd.s32 16, %v2531_v10 }
 0x1a4   : > { %v2960_v58 = vpop.permute.xlu1 %1388 }
 0x1a5   : > { %vm1225_vm11 = vcmp.gt.s32.totalorder %v1188_v39, %v3020_v27 }
 0x1a6   : > { %v2970_v61 = vpop.permute.xlu0 %1400 }
 0x1a8   : > { %v2964_v42 = vpop.permute.xlu1 %1396 }
 0x1a9   : > { %3397 = vst [vmem:[#allocation11_spill] sm:$0xff] %v2964_v42  ;;  %v1190_v42 = vadd.s32 32, %v2531_v10 }
 0x1aa   : > { %v2974_v1 = vpop.permute.xlu0 %1408 }
 0x1ab   : > { %vm1227_vm15 = vcmp.gt.s32.totalorder %v1190_v42, %v3020_v27 }
 0x1ac   : > { %v2968_v60 = vpop.permute.xlu1 %1404 }
 0x1ae   : > { %v2978_v5 = vpop.permute.xlu0 %1416 }
 0x1b0   : > { %v2972_v63 = vpop.permute.xlu1 %1412 }
 0x1b2   : > { %v2982_v7 = vpop.permute.xlu0 %1424 }
 0x1b3   : > { %3400 = vst [vmem:[#allocation14_spill] sm:$0xff] %v2982_v7 }
 0x1b4   : > { %v2976_v4 = vpop.permute.xlu1 %1420 }
 0x1b6   : > { %v2986_v9 = vpop.permute.xlu0 %1432 }
 0x1b7   : > { %3402 = vst [vmem:[#allocation16_spill] sm:$0xff] %v2986_v9  ;;  %v2058_v9 = vsel %vm1230_vm4, 1.0, %v3387_v37 }
 0x1b8   : > { %v2980_v6 = vpop.permute.xlu1 %1428 }
 0x1b9   : > { %3399 = vst [vmem:[#allocation13_spill] sm:$0xff] %v2980_v6 }
 0x1ba   : > { %v2990_v15 = vpop.permute.xlu0 %1443 }
 0x1bc   : > { %v2984_v44 = vpop.permute.xlu1 %1436 }
 0x1bd   : > { %3401 = vst [vmem:[#allocation15_spill] sm:$0xff] %v2984_v44  ;;  %v1196_v44 = vadd.s32 80, %v2531_v10 }
 0x1be   : > { %v2994_v46 = vpop.permute.xlu0 %1451 }
 0x1bf   : > { %vm1233_vm10 = vcmp.gt.s32.totalorder %v1196_v44, %v3020_v27 }
 0x1c0   : > { %v2988_v12 = vpop.permute.xlu1 %1447 }
 0x1c2   : > { %v2998_v53 = vpop.permute.xlu0 %1459 }
 0x1c3   : > { %3404 = vst [vmem:[#allocation18_spill] sm:$0xff] %v2998_v53  ;;  %v3049_v53 = vmul.f32 1e+12, %v2058_v9  ;;  %v1198_v9 = vadd.s32 96, %v2531_v10 }
 0x1c4   : > { %v2992_v16 = vpop.permute.xlu1 %1455 }
 0x1c5   : > { %vm1235_vm14 = vcmp.gt.s32.totalorder %v1198_v9, %v3020_v27 }
 0x1c6   : > { %v3002_v20 = vpop.permute.xlu0 %1467 }
 0x1c8   : > { %v2996_v51 = vpop.permute.xlu1 %1463 }
 0x1c9   : > { %3403 = vst [vmem:[#allocation17_spill] sm:$0xff] %v2996_v51  ;;  %v1191_v51 = vadd.s32 40, %v2531_v10 }
 0x1ca   : > { %v3006_v11 = vpop.permute.xlu0 %1475 }
 0x1cb   : > { %vm1228_vm13 = vcmp.gt.s32.totalorder %v1191_v51, %v3020_v27  ;;  %v1200_v51 = vadd.s32 112, %v2531_v10 }
 0x1cc   : > { %v3000_v18 = vpop.permute.xlu1 %1471 }
 0x1cd   : > { %vm1237_vm1 = vcmp.gt.s32.totalorder %v1200_v51, %v3020_v27 }
 0x1ce   : > { %v3010_v22 = vpop.permute.xlu0 %1483 }
 0x1d0   : > { %v3004_v19 = vpop.permute.xlu1 %1479 }
 0x1d2   : > { %v3014_v24 = vpop.permute.xlu0 %1491 }
 0x1d3   : > { %3406 = vst [vmem:[#allocation20_spill] sm:$0xff] %v3014_v24  ;;  %v2054_v24 = vsel %vm1226_vm9, 1.0, %v3387_v37 }
 0x1d4   : > { %v3008_v21 = vpop.permute.xlu1 %1487  ;;  %v3071_v54 = vmul.f32 1e+12, %v2054_v24 }
 0x1d6   : > { %v3023_v32 = vpop.permute.xlu0 %1499 }
 0x1d7   : > { %3408 = vst [vmem:[#allocation22_spill] sm:$0xff] %v3023_v32 }
 0x1d8   : > { %v3012_v23 = vpop.permute.xlu1 %1495 }
 0x1d9   : > { %3405 = vst [vmem:[#allocation19_spill] sm:$0xff] %v3012_v23 }
 0x1da   : > { %v1511_v32 = vpop.permute.xlu0 %1510 }
 0x1dc   : > { %v3016_v62 = vpop.permute.xlu1 %1503 }
 0x1dd   : > { %3407 = vst [vmem:[#allocation21_spill] sm:$0xff] %v3016_v62  ;;  %v2059_v62 = vsel %vm1231_vm7, 1.0, %v3387_v37 }
 0x1de   : > { %v3059_v28 = vmul.f32 1e+12, %v2059_v62  ;;  %v1201_v62 = vadd.s32 120, %v2531_v10 }
 0x1e0   : > { %v1515_v3 = vpop.permute.xlu1 %1514  ;;  %vm1238_vm0 = vcmp.gt.s32.totalorder %v1201_v62, %v3020_v27 }
 0x1e4   : > { %v3047_v52 = vpop.permute.xlu1 %1522 }
 0x1e8   : > { %v3079_v36 = vpop.permute.xlu1 %1530 }
 0x21c   : > { %v2194_v35 = vpop.f32.mrf.mxu0 }
 0x21d   : > { %v1168_v2 = vmul.f32 0.25, %v2194_v35  ;;  %v3066_v35 = vpop.permute.xlu0 %1518 }
 0x21e   : > { %v1088_v7 = vpop.f32.mrf.mxu0 }
 0x21f   : > { %v1288_v40 = vsub.f32 %v1168_v2, %v1272_v55  ;;  %v1167_v23 = vmul.f32 0.25, %v1088_v7 }
 0x221   : > { %v1573_v37 = vadd.f32 %v2922_v17, %v1288_v40  ;;  %v1589_v6 = vadd.f32 %v2956_v56, %v1288_v40  ;;  %v1605_v7 = vadd.f32 %v2988_v12, %v1288_v40  ;;  %v1621_v55 = vadd.f32 %v1515_v3, %v1288_v40 }
 0x222   : > { %v1287_v2 = vsub.f32 %v1167_v23, %v1271_v0 }
 0x223   : > { %v1683_v24 = vadd.f32 %v2562_v26, %v1573_v37  ;;  %v1699_v33 = vadd.f32 %v2569_v30, %v1589_v6  ;;  %v1715_v17 = vadd.f32 %v2572_v31, %v1605_v7  ;;  %v1731_v56 = vadd.f32 %v2583_v34, %v1621_v55  ;;  %v3097_v6 = vpop.permute.xlu0 %1526 }
 0x224   : > { %v1572_v12 = vadd.f32 %v2925_v13, %v1287_v2  ;;  %v1588_v40 = vadd.f32 %v2958_v57, %v1287_v2  ;;  %v1604_v23 = vadd.f32 %v2990_v15, %v1287_v2  ;;  %v1620_v3 = vadd.f32 %v1511_v32, %v1287_v2 }
 0x225   : > { %1747 = vst [vmem:[%s3091_s24 + $0x8] sm:$0xff] %v1683_v24  ;;  %1763 = vst [vmem:[%s3091_s24 + $0x88] sm:$0xff] %v1699_v33  ;;  %v3409_v13 = vmov 0.0  }
 0x226   : > { %1779 = vst [vmem:[%s3091_s24 + $0x108] sm:$0xff] %v1715_v17  ;;  %1795 = vst [vmem:[%s3091_s24 + $0x188] sm:$0xff] %v1731_v56  ;;  %v2061_v57 = vsel %vm1233_vm10, 1.0, %v3409_v13  ;;  %v2053_v15 = vsel %vm1225_vm11, 1.0, %v3409_v13  ;;  %v2064_v33 = vsel %vm1236_vm12, 1.0, %v3409_v13  ;;  %v1682_v32 = vadd.f32 %v2562_v26, %v1572_v12  ;;  %v2203_v7 = vpop.f32.mrf.mxu1  ;;  %v1539_v17 = vpop.permute.xlu1 %1538 }
 0x227   : > { %v1698_v37 = vadd.f32 %v2569_v30, %v1588_v40  ;;  %v1714_v0 = vadd.f32 %v2572_v31, %v1604_v23  ;;  %v1730_v44 = vadd.f32 %v2583_v34, %v1620_v3  ;;  %v1174_v55 = vmul.f32 0.25, %v2203_v7 }
 0x228   : > { %v2056_v39 = vsel %vm1228_vm13, 1.0, %v3409_v13  ;;  %v2063_v41 = vsel %vm1235_vm14, 1.0, %v3409_v13  ;;  %v2055_v2 = vsel %vm1227_vm15, 1.0, %v3409_v13  ;;  %1746 = vst [vmem:[%s3091_s24] sm:$0xff] %v1682_v32  ;;  %v1118_v24 = vpop.f32.mrf.mxu1  ;;  %v3126_v56 = vmul.f32 1e+12, %v2061_v57 }
 0x229   : > { %1762 = vst [vmem:[%s3091_s24 + $0x80] sm:$0xff] %v1698_v37  ;;  %1778 = vst [vmem:[%s3091_s24 + $0x100] sm:$0xff] %v1714_v0  ;;  %v3128_v12 = vmul.f32 1e+12, %v2053_v15  ;;  %v1294_v40 = vsub.f32 %v1174_v55, %v3049_v53  ;;  %v1173_v9 = vmul.f32 0.25, %v1118_v24  ;;  %v2066_v42 = vsel %vm1238_vm0, 1.0, %v3409_v13  ;;  %v1535_v0 = vpop.permute.xlu0 %1534 }
 0x22a   : > { %1794 = vst [vmem:[%s3091_s24 + $0x180] sm:$0xff] %v1730_v44  ;;  %v3132_v23 = vmul.f32 1e+12, %v2064_v33  ;;  %v2206_v3 = vpop.f32.mrf.mxu1  ;;  %v3137_v32 = vmul.f32 1e+12, %v2056_v39 }
 0x22b   : > { %v3139_v37 = vmul.f32 1e+12, %v2063_v41  ;;  %v3141_v57 = vmul.f32 1e+12, %v2055_v2  ;;  %v1579_v15 = vadd.f32 %v2936_v43, %v1294_v40  ;;  %v1595_v10 = vadd.f32 %v2968_v60, %v1294_v40 }
 0x22c   : > { %v1611_v53 = vadd.f32 %v3000_v18, %v1294_v40  ;;  %v1293_v33 = vsub.f32 %v1173_v9, %v3054_v8  ;;  %v1627_v62 = vadd.f32 %v1539_v17, %v1294_v40  ;;  %v1176_v44 = vmul.f32 0.25, %v2206_v3  ;;  %v1128_v7 = vpop.f32.mrf.mxu1  ;;  %v1547_v17 = vpop.permute.xlu1 %1546 }
 0x22d   : > { %v3147_v55 = vmul.f32 1e+12, %v2066_v42  ;;  %v1689_v39 = vadd.f32 %v2562_v26, %v1579_v15  ;;  %v1705_v43 = vadd.f32 %v2569_v30, %v1595_v10  ;;  %v1175_v9 = vmul.f32 0.25, %v1128_v7  ;;  %v1543_v51 = vpop.permute.xlu0 %1542 }
 0x22e   : > { %v1721_v60 = vadd.f32 %v2572_v31, %v1611_v53  ;;  %v1578_v18 = vadd.f32 %v2938_v45, %v1293_v33  ;;  %v1594_v8 = vadd.f32 %v2970_v61, %v1293_v33  ;;  %v1610_v41 = vadd.f32 %v3002_v20, %v1293_v33 }
 0x22f   : > { %v1737_v2 = vadd.f32 %v2583_v34, %v1627_v62  ;;  %v1296_v24 = vsub.f32 %v1176_v44, %v3056_v25  ;;  %1753 = vst [vmem:[%s3091_s24 + $0x38] sm:$0xff] %v1689_v39  ;;  %1769 = vst [vmem:[%s3091_s24 + $0xb8] sm:$0xff] %v1705_v43  ;;  %v1626_v42 = vadd.f32 %v1535_v0, %v1293_v33  ;;  %v3165_v45 = vsel %vm1237_vm1, 1.0, %v3409_v13 }
 0x230   : > { %1785 = vst [vmem:[%s3091_s24 + $0x138] sm:$0xff] %v1721_v60  ;;  %v1688_v40 = vadd.f32 %v2562_v26, %v1578_v18  ;;  %v1704_v61 = vadd.f32 %v2569_v30, %v1594_v8  ;;  %v1720_v20 = vadd.f32 %v2572_v31, %v1610_v41  ;;  %v2209_v15 = vpop.f32.mrf.mxu1  ;;  %v1295_v53 = vsub.f32 %v1175_v9, %v3059_v28 }
 0x231   : > { %1801 = vst [vmem:[%s3091_s24 + $0x1b8] sm:$0xff] %v1737_v2  ;;  %v1581_v25 = vadd.f32 %v2940_v47, %v1296_v24  ;;  %v1597_v3 = vadd.f32 %v2972_v63, %v1296_v24  ;;  %v1613_v10 = vadd.f32 %v3004_v19, %v1296_v24  ;;  %v1736_v27 = vadd.f32 %v2583_v34, %v1626_v42  ;;  %v2197_v33 = vpop.f32.mrf.mxu0 }
 0x232   : > { %1752 = vst [vmem:[%s3091_s24 + $0x30] sm:$0xff] %v1688_v40  ;;  %v1629_v13 = vadd.f32 %v1547_v17, %v1296_v24  ;;  %1768 = vst [vmem:[%s3091_s24 + $0xb0] sm:$0xff] %v1704_v61  ;;  %v1178_v0 = vmul.f32 0.25, %v2209_v15  ;;  %v1170_v62 = vmul.f32 0.25, %v2197_v33  ;;  %v1138_v19 = vpop.f32.mrf.mxu1  ;;  %v1580_v44 = vadd.f32 %v2942_v48, %v1295_v53 }
 0x233   : > { %1784 = vst [vmem:[%s3091_s24 + $0x130] sm:$0xff] %v1720_v20  ;;  %v1691_v47 = vadd.f32 %v2562_v26, %v1581_v25  ;;  %v1707_v63 = vadd.f32 %v2569_v30, %v1597_v3  ;;  %v1723_v28 = vadd.f32 %v2572_v31, %v1613_v10  ;;  %v1596_v7 = vadd.f32 %v2974_v1, %v1295_v53 }
 0x234   : > { %v1612_v39 = vadd.f32 %v3006_v11, %v1295_v53  ;;  %1800 = vst [vmem:[%s3091_s24 + $0x1b0] sm:$0xff] %v1736_v27  ;;  %v1739_v43 = vadd.f32 %v2583_v34, %v1629_v13  ;;  %v1298_v60 = vsub.f32 %v1178_v0, %v3068_v29  ;;  %v1628_v18 = vadd.f32 %v1543_v51, %v1295_v53 }
 0x235   : > { %1755 = vst [vmem:[%s3091_s24 + $0x48] sm:$0xff] %v1691_v47  ;;  %1771 = vst [vmem:[%s3091_s24 + $0xc8] sm:$0xff] %v1707_v63  ;;  %v1290_v8 = vsub.f32 %v1170_v62, %v3071_v54  ;;  %v1690_v48 = vadd.f32 %v2562_v26, %v1580_v44  ;;  %v1706_v1 = vadd.f32 %v2569_v30, %v1596_v7  ;;  %v1177_v41 = vmul.f32 0.25, %v1138_v19 }
 0x236   : > { %1787 = vst [vmem:[%s3091_s24 + $0x148] sm:$0xff] %v1723_v28  ;;  %v1722_v11 = vadd.f32 %v2572_v31, %v1612_v39  ;;  %1803 = vst [vmem:[%s3091_s24 + $0x1c8] sm:$0xff] %v1739_v43  ;;  %v1583_v2 = vadd.f32 %v2944_v49, %v1298_v60  ;;  %v1599_v24 = vadd.f32 %v2976_v4, %v1298_v60  ;;  %v1098_v49 = vpop.f32.mrf.mxu0  ;;  %v1551_v4 = vpop.permute.xlu0 %1550 }
 0x237   : > { %v1615_v17 = vadd.f32 %v3008_v21, %v1298_v60  ;;  %v1738_v29 = vadd.f32 %v2583_v34, %v1628_v18  ;;  %1754 = vst [vmem:[%s3091_s24 + $0x40] sm:$0xff] %v1690_v48  ;;  %1770 = vst [vmem:[%s3091_s24 + $0xc0] sm:$0xff] %v1706_v1  ;;  %v1575_v54 = vadd.f32 %v2928_v14, %v1290_v8  ;;  %v1169_v13 = vmul.f32 0.25, %v1098_v49  ;;  %v3410_v18 = vld [vmem:[#allocation7_spill] sm:$0xff]  ;;  %v3415_v49 = vld [vmem:[#allocation17_spill] sm:$0xff] }
 0x238   : > { %1786 = vst [vmem:[%s3091_s24 + $0x140] sm:$0xff] %v1722_v11  ;;  %v1591_v40 = vadd.f32 %v2960_v58, %v1290_v8  ;;  %v1607_v9 = vadd.f32 %v2992_v16, %v1290_v8  ;;  %v1623_v42 = vadd.f32 %v3047_v52, %v1290_v8  ;;  %v1693_v21 = vadd.f32 %v2562_v26, %v1583_v2  ;;  %v1555_v58 = vpop.permute.xlu1 %1554  ;;  %v2212_v16 = vpop.f32.mrf.mxu1  ;;  %v3412_v48 = vld [vmem:[#allocation19_spill] sm:$0xff]  ;;  %v3413_v11 = vld [vmem:[#allocation5_spill] sm:$0xff] }
 0x239   : > { %v1709_v61 = vadd.f32 %v2569_v30, %v1599_v24  ;;  %v1725_v20 = vadd.f32 %v2572_v31, %v1615_v17  ;;  %1802 = vst [vmem:[%s3091_s24 + $0x1c0] sm:$0xff] %v1738_v29  ;;  %v1297_v14 = vsub.f32 %v1177_v41, %v3126_v56  ;;  %v1685_v52 = vadd.f32 %v2562_v26, %v1575_v54  ;;  %v2200_v10 = vpop.f32.mrf.mxu0 }
 0x23a   : > { %v1701_v25 = vadd.f32 %v2569_v30, %v1591_v40  ;;  %v1717_v3 = vadd.f32 %v2572_v31, %v1607_v9  ;;  %v1733_v15 = vadd.f32 %v2583_v34, %v1623_v42  ;;  %1757 = vst [vmem:[%s3091_s24 + $0x58] sm:$0xff] %v1693_v21  ;;  %v1631_v51 = vadd.f32 %v1555_v58, %v1298_v60  ;;  %v1148_v7 = vpop.f32.mrf.mxu1  ;;  %v3414_v9 = vld [vmem:[#allocation11_spill] sm:$0xff] }
 0x23b   : > { %1773 = vst [vmem:[%s3091_s24 + $0xd8] sm:$0xff] %v1709_v61  ;;  %1789 = vst [vmem:[%s3091_s24 + $0x158] sm:$0xff] %v1725_v20  ;;  %v1582_v53 = vadd.f32 %v2946_v50, %v1297_v14  ;;  %v1598_v56 = vadd.f32 %v2978_v5, %v1297_v14  ;;  %v1614_v27 = vadd.f32 %v3010_v22, %v1297_v14  ;;  %v1180_v47 = vmul.f32 0.25, %v2212_v16  ;;  %v1108_v24 = vpop.f32.mrf.mxu0 }
 0x23c   : > { %1749 = vst [vmem:[%s3091_s24 + $0x18] sm:$0xff] %v1685_v52  ;;  %1765 = vst [vmem:[%s3091_s24 + $0x98] sm:$0xff] %v1701_v25  ;;  %v1630_v33 = vadd.f32 %v1551_v4, %v1297_v14  ;;  %v1172_v63 = vmul.f32 0.25, %v2200_v10  ;;  %v1289_v22 = vsub.f32 %v1169_v13, %v3128_v12  ;;  %v1741_v62 = vadd.f32 %v2583_v34, %v1631_v51  ;;  %v1563_v17 = vpop.permute.xlu1 %1562  ;;  %v1559_v25 = vpop.permute.xlu0 %1558 }
 0x23d   : > { %1781 = vst [vmem:[%s3091_s24 + $0x118] sm:$0xff] %v1717_v3  ;;  %1797 = vst [vmem:[%s3091_s24 + $0x198] sm:$0xff] %v1733_v15  ;;  %v1692_v0 = vadd.f32 %v2562_v26, %v1582_v53  ;;  %v1708_v50 = vadd.f32 %v2569_v30, %v1598_v56  ;;  %v1724_v5 = vadd.f32 %v2572_v31, %v1614_v27  ;;  %v1179_v20 = vmul.f32 0.25, %v1148_v7 }
 0x23e   : > { %v1740_v19 = vadd.f32 %v2583_v34, %v1630_v33  ;;  %v1300_v28 = vsub.f32 %v1180_v47, %v3132_v23  ;;  %v1292_v44 = vsub.f32 %v1172_v63, %v3137_v32  ;;  %v1574_v39 = vadd.f32 %v2930_v38, %v1289_v22  ;;  %1805 = vst [vmem:[%s3091_s24 + $0x1d8] sm:$0xff] %v1741_v62  ;;  %v3411_v23 = vld [vmem:[#allocation13_spill] sm:$0xff]  ;;  %v3416_v33 = vld [vmem:[#allocation8_spill] sm:$0xff]  ;;  %v3417_v63 = vld [vmem:[#allocation14_spill] sm:$0xff] }
 0x23f   : > { %1756 = vst [vmem:[%s3091_s24 + $0x50] sm:$0xff] %v1692_v0  ;;  %1772 = vst [vmem:[%s3091_s24 + $0xd0] sm:$0xff] %v1708_v50  ;;  %v1590_v43 = vadd.f32 %v2962_v59, %v1289_v22  ;;  %v1606_v60 = vadd.f32 %v2994_v46, %v1289_v22  ;;  %v1622_v12 = vadd.f32 %v3066_v35, %v1289_v22  ;;  %v2215_v41 = vpop.f32.mrf.mxu1  ;;  %v1171_v16 = vmul.f32 0.25, %v1108_v24  ;;  %v3418_v50 = vld [vmem:[#allocation20_spill] sm:$0xff] }
 0x240   : > { %1788 = vst [vmem:[%s3091_s24 + $0x150] sm:$0xff] %v1724_v5  ;;  %1804 = vst [vmem:[%s3091_s24 + $0x1d0] sm:$0xff] %v1740_v19  ;;  %v1585_v8 = vadd.f32 %v3410_v18, %v1300_v28  ;;  %v1601_v32 = vadd.f32 %v3411_v23, %v1300_v28  ;;  %v1617_v1 = vadd.f32 %v3412_v48, %v1300_v28  ;;  %v1182_v3 = vmul.f32 0.25, %v2215_v41  ;;  %v3420_v62 = vld [vmem:[#allocation12_spill] sm:$0xff]  ;;  %v3421_v19 = vld [vmem:[#allocation18_spill] sm:$0xff] }
 0x241   : > { %v1577_v38 = vadd.f32 %v3413_v11, %v1292_v44  ;;  %v1684_v59 = vadd.f32 %v2562_v26, %v1574_v39  ;;  %v1700_v46 = vadd.f32 %v2569_v30, %v1590_v43  ;;  %v1716_v35 = vadd.f32 %v2572_v31, %v1606_v60  ;;  %v1158_v14 = vpop.f32.mrf.mxu1  ;;  %v1571_v60 = vpop.permute.xlu1 %1570  ;;  %v3422_v23 = vld [vmem:[#allocation9_spill] sm:$0xff]  ;;  %v3423_v48 = vld [vmem:[#allocation15_spill] sm:$0xff] }
 0x242   : > { %v1732_v2 = vadd.f32 %v2583_v34, %v1622_v12  ;;  %v1695_v29 = vadd.f32 %v2562_v26, %v1585_v8  ;;  %v1711_v54 = vadd.f32 %v2569_v30, %v1601_v32  ;;  %v1727_v40 = vadd.f32 %v2572_v31, %v1617_v1  ;;  %v3424_v11 = vld [vmem:[#allocation21_spill] sm:$0xff] }
 0x243   : > { %v1593_v42 = vadd.f32 %v3414_v9, %v1292_v44  ;;  %1748 = vst [vmem:[%s3091_s24 + $0x10] sm:$0xff] %v1684_v59  ;;  %1764 = vst [vmem:[%s3091_s24 + $0x90] sm:$0xff] %v1700_v46  ;;  %v1609_v4 = vadd.f32 %v3415_v49, %v1292_v44  ;;  %v1625_v21 = vadd.f32 %v3079_v36, %v1292_v44  ;;  %v1285_v53 = vmul.f32 1e+12, %v3165_v45  ;;  %v3419_v45 = vld [vmem:[#allocation6_spill] sm:$0xff]  ;;  %v1567_v59 = vpop.permute.xlu0 %1566 }
 0x244   : > { %1780 = vst [vmem:[%s3091_s24 + $0x110] sm:$0xff] %v1716_v35  ;;  %1796 = vst [vmem:[%s3091_s24 + $0x190] sm:$0xff] %v1732_v2  ;;  %v1687_v61 = vadd.f32 %v2562_v26, %v1577_v38  ;;  %v1633_v52 = vadd.f32 %v1563_v17, %v1300_v28  ;;  %v1299_v10 = vsub.f32 %v1179_v20, %v3139_v37  ;;  %v1181_v51 = vmul.f32 0.25, %v1158_v14  ;;  %v3425_v17 = vld [vmem:[#allocation10_spill] sm:$0xff] }
 0x245   : > { %1759 = vst [vmem:[%s3091_s24 + $0x68] sm:$0xff] %v1695_v29  ;;  %1775 = vst [vmem:[%s3091_s24 + $0xe8] sm:$0xff] %v1711_v54  ;;  %v1703_v58 = vadd.f32 %v2569_v30, %v1593_v42  ;;  %v1719_v15 = vadd.f32 %v2572_v31, %v1609_v4  ;;  %v1735_v36 = vadd.f32 %v2583_v34, %v1625_v21  ;;  %v3426_v54 = vld [vmem:[#allocation16_spill] sm:$0xff]  ;;  %v3427_v9 = vld [vmem:[#allocation22_spill] sm:$0xff] }
 0x246   : > { %1791 = vst [vmem:[%s3091_s24 + $0x168] sm:$0xff] %v1727_v40  ;;  %1751 = vst [vmem:[%s3091_s24 + $0x28] sm:$0xff] %v1687_v61  ;;  %v1291_v56 = vsub.f32 %v1171_v16, %v3141_v57  ;;  %v1743_v27 = vadd.f32 %v2583_v34, %v1633_v52  ;;  %v1302_v13 = vsub.f32 %v1182_v3, %v3147_v55 }
 0x247   : > { %1767 = vst [vmem:[%s3091_s24 + $0xa8] sm:$0xff] %v1703_v58  ;;  %1783 = vst [vmem:[%s3091_s24 + $0x128] sm:$0xff] %v1719_v15  ;;  %v1584_v47 = vadd.f32 %v3416_v33, %v1299_v10  ;;  %v1600_v0 = vadd.f32 %v3417_v63, %v1299_v10  ;;  %v1616_v5 = vadd.f32 %v3418_v50, %v1299_v10 }
 0x248   : > { %1799 = vst [vmem:[%s3091_s24 + $0x1a8] sm:$0xff] %v1735_v36  ;;  %v1632_v37 = vadd.f32 %v1559_v25, %v1299_v10  ;;  %v1576_v22 = vadd.f32 %v3419_v45, %v1291_v56  ;;  %v1592_v57 = vadd.f32 %v3420_v62, %v1291_v56  ;;  %v1608_v55 = vadd.f32 %v3421_v19, %v1291_v56 }
 0x249   : > { %v1624_v28 = vadd.f32 %v3097_v6, %v1291_v56  ;;  %1807 = vst [vmem:[%s3091_s24 + $0x1e8] sm:$0xff] %v1743_v27  ;;  %v1694_v44 = vadd.f32 %v2562_v26, %v1584_v47  ;;  %v1710_v7 = vadd.f32 %v2569_v30, %v1600_v0  ;;  %v1726_v39 = vadd.f32 %v2572_v31, %v1616_v5 }
 0x24a   : > { %v1742_v43 = vadd.f32 %v2583_v34, %v1632_v37  ;;  %v1686_v12 = vadd.f32 %v2562_v26, %v1576_v22  ;;  %v1702_v18 = vadd.f32 %v2569_v30, %v1592_v57  ;;  %v1718_v6 = vadd.f32 %v2572_v31, %v1608_v55 }
 0x24b   : > { %v1734_v8 = vadd.f32 %v2583_v34, %v1624_v28  ;;  %1758 = vst [vmem:[%s3091_s24 + $0x60] sm:$0xff] %v1694_v44  ;;  %1774 = vst [vmem:[%s3091_s24 + $0xe0] sm:$0xff] %v1710_v7  ;;  %v1587_v32 = vadd.f32 %v3422_v23, %v1302_v13  ;;  %v1603_v1 = vadd.f32 %v3423_v48, %v1302_v13 }
 0x24c   : > { %1790 = vst [vmem:[%s3091_s24 + $0x160] sm:$0xff] %v1726_v39  ;;  %1806 = vst [vmem:[%s3091_s24 + $0x1e0] sm:$0xff] %v1742_v43  ;;  %v1619_v38 = vadd.f32 %v3424_v11, %v1302_v13  ;;  %v1301_v41 = vsub.f32 %v1181_v51, %v1285_v53  ;;  %v1635_v46 = vadd.f32 %v1571_v60, %v1302_v13 }
 0x24d   : > { %1750 = vst [vmem:[%s3091_s24 + $0x20] sm:$0xff] %v1686_v12  ;;  %1766 = vst [vmem:[%s3091_s24 + $0xa0] sm:$0xff] %v1702_v18  ;;  %v1697_v35 = vadd.f32 %v2562_v26, %v1587_v32  ;;  %v1713_v2 = vadd.f32 %v2569_v30, %v1603_v1 }
 0x24e   : > { %1782 = vst [vmem:[%s3091_s24 + $0x120] sm:$0xff] %v1718_v6  ;;  %1798 = vst [vmem:[%s3091_s24 + $0x1a0] sm:$0xff] %v1734_v8  ;;  %v1729_v24 = vadd.f32 %v2572_v31, %v1619_v38  ;;  %v1586_v29 = vadd.f32 %v3425_v17, %v1301_v41  ;;  %v1602_v40 = vadd.f32 %v3426_v54, %v1301_v41 }
 0x24f   : > { %v1618_v42 = vadd.f32 %v3427_v9, %v1301_v41  ;;  %v1745_v49 = vadd.f32 %v2583_v34, %v1635_v46  ;;  %v1634_v4 = vadd.f32 %v1567_v59, %v1301_v41  ;;  %1761 = vst [vmem:[%s3091_s24 + $0x78] sm:$0xff] %v1697_v35  ;;  %1777 = vst [vmem:[%s3091_s24 + $0xf8] sm:$0xff] %v1713_v2 }
 0x250   : > { %1793 = vst [vmem:[%s3091_s24 + $0x178] sm:$0xff] %v1729_v24  ;;  %v1696_v21 = vadd.f32 %v2562_v26, %v1586_v29  ;;  %v1712_v61 = vadd.f32 %v2569_v30, %v1602_v40 }
 0x251   : > { %v1728_v20 = vadd.f32 %v2572_v31, %v1618_v42  ;;  %1809 = vst [vmem:[%s3091_s24 + $0x1f8] sm:$0xff] %v1745_v49  ;;  %v1744_v14 = vadd.f32 %v2583_v34, %v1634_v4 }
 0x252   : > { %1760 = vst [vmem:[%s3091_s24 + $0x70] sm:$0xff] %v1696_v21  ;;  %1776 = vst [vmem:[%s3091_s24 + $0xf0] sm:$0xff] %v1712_v61 }
 0x253   : > { %1792 = vst [vmem:[%s3091_s24 + $0x170] sm:$0xff] %v1728_v20  ;;  %1808 = vst [vmem:[%s3091_s24 + $0x1f0] sm:$0xff] %v1744_v14 }
 0x254   : > { %2322 = shalt.err (!%p2319_p5)
}
 0x255   : > { %s2323_s26 = scalar_lea.hbm %s3319_s16, 8192  ;;  %s2327_s25 = scalar_lea.hbm %s3386_s8, 16384 }
 0x256   : > { %p2324_p6 = scmp.ne.s32.totalorder %s3319_s16, %s2323_s26  ;;  %p2328_p10 = scmp.lt.s32.totalorder %s3319_s16, %s3386_s8 }
 0x257   : > { %p2329_p11 = scmp.lt.s32.totalorder %s2327_s25, %s2323_s26 }
 0x258   : > { %p2325_p7 = pnand %p2324_p6, %p2479_p4 }
 0x259   : > { %p2330_p12 = por %p2329_p11, %p2328_p10 }
 0x25a   : > { %p2326_p9 = pneg %p2325_p7 }
 0x25c   : > { %p2331_p13 = pnand %p2330_p12, %p2326_p9 }
 0x25e   : > { %2334 = shalt.err (!%p2331_p13)
}
 0x25f   : > { %s2392_s20 = smov 128   ;;  %s2393_s21 = smov 8  }
 0x260   : > { %2248 = dma.vmem_to_hbm [thread:$0]  (%p2479_p4), %s3321_s11, 8192, %s3319_s16, %s3333_s19, %s2392_s20, %s2392_s20, %s2393_s21  }
 0x261 PF: > { %p2254_p0 = scmp.ge.s32.totalorder %s2385_s10, 2  ;;  %s1842_s12 = sand.u32 1, %s2365_s27  }
 0x262   : > { %s1843_s23 = scalar_lea.sflag [#allocation3], %s1842_s12 }
 0x263   : > { %p2251_p1 = pnand %p2254_p0, %p2486_p8 }
 0x265   : > { %p2252_p2 = pneg %p2251_p1 }
 0x267   : > { %2360 = dma.done.wait (%p2252_p2), %s1843_s23, 8192  }
 0x268   : > { %2362 = vsyncadd (%p2252_p2), %s1843_s23, 4294959104  ;;  %s21_s10 = sadd.s32 1, %s2385_s10   ;;  %s3428_s27 = smov %s2369_s28 }
 0x269   : > { %p18_p3 = scmp.ge.s32.totalorder %s21_s10, 4   ;;  %s3429_s28 = smov %s2373_s29 }
 0x26a   : > { %s3430_s29 = smov %s2492_s18  ;;  %s3431_s30 = smov %s2381_s9 }
 0x26b   : > { %s3432_s9 = smov %s3434_s13  ;;  %20 = sbr.rel (!%p18_p3) target bundleno = 4 (0x4), region = 102 }
 0x270   :  { %1848 = vsyncpa [#allocation3], 1 }
 0x271   :  { %1850 = vsyncpa [#allocation3 + $0x1], 1 }

</bundles_post_ra>
